<compile_context>
chip_gen: v7x
topology: tpu7x:2x2x1
jax: 0.10.0
libtpu: 0.0.40
codegen_flags: <defaults>
</compile_context>

<pallas_src>
import functools

import jax
import jax.numpy as jnp
from jax.experimental import pallas as pl
from jax.experimental.pallas import tpu as pltpu


def _layer_norm(x, gamma, beta, eps=1e-6):
    # PyTorch nn.LayerNorm: biased variance over the last dim, eps=1e-6 per the module.
    mean = jnp.mean(x, axis=-1, keepdims=True)
    var = jnp.mean(jnp.square(x - mean), axis=-1, keepdims=True)
    return (x - mean) * jax.lax.rsqrt(var + eps) * gamma + beta


def encoder_layer_kernel(n_head, *refs):
    # refs layout: 16 inputs, then 1 or 2 outputs, then 2 scratch buffers.
    (xq_ref, xkv_ref,
     wq_ref, bq_ref, wk_ref, bk_ref, wv_ref, bv_ref,
     wo_ref, bo_ref, w1_ref, b1_ref, w2_ref, b2_ref,
     gamma_ref, beta_ref) = refs[:16]
    rest = refs[16:]
    if len(rest) == 4:
        out_ref, sim_ref, k_sc, v_sc = rest
    else:
        out_ref, k_sc, v_sc = rest
        sim_ref = None

    f32 = jnp.float32
    bf16 = jnp.bfloat16

    xq = xq_ref[0]                         # [tq, D] f32 : query rows (also the residual)
    tq, D = xq.shape
    dk = D // n_head
    scale = 1.0 / (dk ** 0.5)
    t = pl.program_id(1)

    # ---- K/V projections: computed once per batch row, cached in bf16 VMEM scratch ----
    @pl.when(t == 0)
    def _():
        xkv = xkv_ref[0]                   # [S, D] bf16 (pre-cast in the wrapper)
        k = jnp.dot(xkv, wk_ref[...], preferred_element_type=f32) + bk_ref[...]   # [S, D]
        v = jnp.dot(xkv, wv_ref[...], preferred_element_type=f32) + bv_ref[...]   # [S, D]
        # Head split done once per row (amortized over all query tiles of this row).
        for h in range(n_head):
            k_sc[h] = k[:, h * dk:(h + 1) * dk].astype(bf16)
            v_sc[h] = v[:, h * dk:(h + 1) * dk].astype(bf16)

    # ---- Q projection for this tile (scale folded into q before the bf16 cast) ---------
    q = jnp.dot(xq.astype(bf16), wq_ref[...], preferred_element_type=f32) + bq_ref[...]
    q_b = (q * scale).astype(bf16)                                  # [tq, D] bf16, one cast
    qh = jnp.stack([q_b[:, h * dk:(h + 1) * dk] for h in range(n_head)], axis=0)  # [H,tq,dk]

    kh = k_sc[...]                                                  # [H, S, dk] bf16
    vh = v_sc[...]                                                  # [H, S, dk] bf16

    # ---- batched attention (single einsum over heads), softmax in f32 ------------------
    scores = jnp.einsum("hqd,hkd->hqk", qh, kh, preferred_element_type=f32)   # [H, tq, S]
    scores = scores - jnp.max(scores, axis=-1, keepdims=True)
    e = jnp.exp(scores)
    denom = jnp.sum(e, axis=-1, keepdims=True)                      # [H, tq, 1]
    attn = e * (1.0 / denom)          # exact reciprocal on the small denominator: sim sums to 1
    attn_b = attn.astype(bf16)        # single bf16 cast, reused below
    if sim_ref is not None:
        sim_ref[0] = attn_b if sim_ref.dtype == jnp.bfloat16 else attn.astype(sim_ref.dtype)

    ctx = jnp.einsum("hqk,hkd->hqd", attn_b, vh, preferred_element_type=f32)  # [H, tq, dk]
    ctx_b = ctx.astype(bf16)
    ctx_m = jnp.concatenate([ctx_b[h] for h in range(n_head)], axis=-1)       # [tq, D] bf16

    attn_out = jnp.dot(ctx_m, wo_ref[...], preferred_element_type=f32) + bo_ref[...]

    gamma = gamma_ref[...]
    beta = beta_ref[...]

    # residual + shared layer norm (f32)
    y = _layer_norm(xq + attn_out, gamma, beta)

    # ---- position-wise feed forward ----------------------------------------------------
    h1 = jnp.maximum(
        jnp.dot(y.astype(bf16), w1_ref[...], preferred_element_type=f32) + b1_ref[...],
        0.0)
    pff = jnp.dot(h1.astype(bf16), w2_ref[...], preferred_element_type=f32) + b2_ref[...]

    # residual + shared layer norm
    out_ref[0] = _layer_norm(y + pff, gamma, beta).astype(out_ref.dtype)


def _vmem_limit_bytes():
    # Explicit scoped-VMEM limit with headroom; fall back to a conservative value if
    # hardware introspection is unavailable.
    try:
        cap = pltpu.get_tpu_info().vmem_capacity_bytes
    except Exception:
        cap = 128 * 1024 * 1024
    return int(min(int(cap * 0.75), 100 * 1024 * 1024))


def encoder_layer(x, params, n_head, *, q_tile=None, return_sim=True,
                  sim_dtype=jnp.float32, out_dtype=jnp.float32):
    """Pallas EncoderLayer forward. Returns out or (out, sim) like the PyTorch module.

    q_tile: query-tile size. 256 is a good default on v5e/v6e; prefer 128 on v7x
            (64 MiB VMEM) for large S/H, or use the flash-style TODO for very long S.
    """
    B, S, D = x.shape
    HID = params["w1"].shape[1]
    assert D % n_head == 0
    dk = D // n_head
    if q_tile is None:
        q_tile = S if S <= 256 else 256
    assert S % q_tile == 0, "seq_len must be divisible by the query tile"
    n_qt = S // q_tile

    # K/V path only ever consumes bf16 -> pre-cast once in the wrapper (halves that DMA).
    x_kv = x.astype(jnp.bfloat16)

    # MXU operands in bf16 (halves weight DMA); biases / LayerNorm params stay f32.
    def as_mxu(name):
        return params[name].astype(jnp.bfloat16)

    weights = [as_mxu("wq"), params["bq"], as_mxu("wk"), params["bk"],
               as_mxu("wv"), params["bv"], as_mxu("wo"), params["bo"],
               as_mxu("w1"), params["b1"], as_mxu("w2"), params["b2"],
               params["gamma"], params["beta"]]

    def const_spec(w):
        # Constant block index across the whole grid: fetched once, single-buffered.
        return pl.BlockSpec(w.shape, lambda b, t, n=w.ndim: (0,) * n,
                            pipeline_mode=pl.Buffered(1))

    in_specs = [
        pl.BlockSpec((1, q_tile, D), lambda b, t: (b, t, 0)),   # query / residual rows (f32)
        pl.BlockSpec((1, S, D), lambda b, t: (b, 0, 0)),        # full row for K/V (bf16)
    ] + [const_spec(w) for w in weights]

    out_specs = pl.BlockSpec((1, q_tile, D), lambda b, t: (b, t, 0))
    out_shapes = jax.ShapeDtypeStruct((B, S, D), out_dtype)
    if return_sim:
        out_specs = (out_specs,
                     pl.BlockSpec((1, n_head, q_tile, S), lambda b, t: (b, 0, t, 0)))
        out_shapes = (out_shapes,
                      jax.ShapeDtypeStruct((B, n_head, S, S), sim_dtype))

    scratch_shapes = [pltpu.VMEM((n_head, S, dk), jnp.bfloat16),   # cached K (head-split)
                      pltpu.VMEM((n_head, S, dk), jnp.bfloat16)]   # cached V (head-split)

    # Advisory cost estimate (whole call): QKV + out-proj + scores + attn@V + FFN matmuls.
    sim_bytes = 2 if sim_dtype == jnp.bfloat16 else 4
    flops = B * S * (8 * D * D + 4 * S * D + 4 * D * HID)
    transcendentals = B * n_head * S * S + 2 * B * S
    bytes_accessed = (B * S * D * 4 + B * S * D * 2 + B * S * D * 4
                      + (B * n_head * S * S * sim_bytes if return_sim else 0)
                      + 2 * (4 * D * D + 2 * D * HID)
                      + 4 * (6 * D + HID))

    kernel = functools.partial(encoder_layer_kernel, n_head)
    return pl.pallas_call(
        kernel,
        out_shape=out_shapes,
        grid=(B, n_qt),
        in_specs=in_specs,
        out_specs=out_specs,
        scratch_shapes=scratch_shapes,
        compiler_params=pltpu.CompilerParams(
            # batch axis parallel (megacore / dual-TC); query-tile axis arbitrary so the
            # per-row K/V scratch written at t == 0 is valid for every subsequent tile.
            dimension_semantics=("parallel", "arbitrary"),
            vmem_limit_bytes=_vmem_limit_bytes()),
        cost_estimate=pl.CostEstimate(flops=flops,
                                      transcendentals=transcendentals,
                                      bytes_accessed=int(bytes_accessed)),
    )(x, x_kv, *weights)


def ref_encoder_layer(x, p, n_head, mxu_dtype=jnp.float32):
    """Pure-JAX reference mirroring the PyTorch forward (eval mode, no mask).

    mxu_dtype=jnp.bfloat16 applies the same "bf16 operands / f32 accumulation"
    policy as the kernel so the comparison can be tight.
    """
    B, S, D = x.shape
    dk = D // n_head
    scale = 1.0 / (dk ** 0.5)
    f32 = jnp.float32

    def mm(a, b):
        return jnp.dot(a.astype(mxu_dtype), b.astype(mxu_dtype),
                       preferred_element_type=f32)

    q = (mm(x, p["wq"]) + p["bq"]) * scale          # scale folded into q (matches kernel)
    k = mm(x, p["wk"]) + p["bk"]
    v = mm(x, p["wv"]) + p["bv"]
    q = q.reshape(B, S, n_head, dk).transpose(0, 2, 1, 3)
    k = k.reshape(B, S, n_head, dk).transpose(0, 2, 1, 3)
    v = v.reshape(B, S, n_head, dk).transpose(0, 2, 1, 3)

    scores = jnp.einsum("bhqd,bhkd->bhqk", q.astype(mxu_dtype), k.astype(mxu_dtype),
                        preferred_element_type=f32)
    scores = scores - jnp.max(scores, axis=-1, keepdims=True)
    e = jnp.exp(scores)
    attn = e / jnp.sum(e, axis=-1, keepdims=True)

    ctx = jnp.einsum("bhqk,bhkd->bhqd", attn.astype(mxu_dtype), v.astype(mxu_dtype),
                     preferred_element_type=f32)
    ctx = ctx.transpose(0, 2, 1, 3).reshape(B, S, D)
    attn_out = mm(ctx, p["wo"]) + p["bo"]

    y = _layer_norm(x + attn_out, p["gamma"], p["beta"])
    h1 = jnp.maximum(mm(y, p["w1"]) + p["b1"], 0.0)
    pff = mm(h1, p["w2"]) + p["b2"]
    out = _layer_norm(y + pff, p["gamma"], p["beta"])
    return out, attn


def make_params(key, model_dim, n_head, hidden_size):
    ks = jax.random.split(key, 8)
    s = 0.1
    return {
        "wq": s * jax.random.normal(ks[0], (model_dim, model_dim), jnp.float32),
        "wk": s * jax.random.normal(ks[1], (model_dim, model_dim), jnp.float32),
        "wv": s * jax.random.normal(ks[2], (model_dim, model_dim), jnp.float32),
        "wo": s * jax.random.normal(ks[3], (model_dim, model_dim), jnp.float32),
        "bq": s * jax.random.normal(ks[4], (1, model_dim), jnp.float32),
        "bk": jnp.zeros((1, model_dim), jnp.float32),
        "bv": jnp.zeros((1, model_dim), jnp.float32),
        "bo": jnp.zeros((1, model_dim), jnp.float32),
        "w1": s * jax.random.normal(ks[5], (model_dim, hidden_size), jnp.float32),
        "b1": s * jax.random.normal(ks[6], (1, hidden_size), jnp.float32),
        "w2": s * jax.random.normal(ks[7], (hidden_size, model_dim), jnp.float32),
        "b2": jnp.zeros((1, model_dim), jnp.float32),
        "gamma": jnp.ones((1, model_dim), jnp.float32),
        "beta": jnp.zeros((1, model_dim), jnp.float32),
    }


if __name__ == "__main__":
    # Small deterministic shapes; q_tile=8 with S=16 gives 2 query tiles per row so the
    # cached-K/V (t > 0 reuse) path is actually exercised.
    B, S, D, H, HID = 2, 16, 32, 4, 64
    key = jax.random.PRNGKey(0)
    kx, kp = jax.random.split(key)
    x = jax.random.normal(kx, (B, S, D), jnp.float32)
    params = make_params(kp, D, H, HID)

    out, sim = encoder_layer(x, params, H, q_tile=8)
    jax.block_until_ready((out, sim))
    assert out.shape == (B, S, D) and sim.shape == (B, H, S, S)

    # Tight check vs. a reference using the same bf16-MXU / f32-accumulate policy.
    ref_out, ref_sim = ref_encoder_layer(x, params, H, mxu_dtype=jnp.bfloat16)
    assert jnp.allclose(out, ref_out, atol=5e-3, rtol=5e-3), \
        float(jnp.max(jnp.abs(out - ref_out)))
    assert jnp.allclose(sim, ref_sim, atol=5e-3, rtol=5e-3), \
        float(jnp.max(jnp.abs(sim - ref_sim)))

    # Loose sanity check vs. full-f32 math (bf16 MXU operands add ~1e-3 relative error).
    f32_out, f32_sim = ref_encoder_layer(x, params, H, mxu_dtype=jnp.float32)
    assert jnp.allclose(out, f32_out, atol=5e-2, rtol=5e-2)
    assert jnp.allclose(sim, f32_sim, atol=2e-2, rtol=2e-2)

    # Fast path without the [B,H,S,S] attention-weights writeback.
    out_nosim = encoder_layer(x, params, H, q_tile=8, return_sim=False)
    jax.block_until_ready(out_nosim)
    assert jnp.allclose(out_nosim, out, atol=1e-6, rtol=1e-6)

    print("KERNEL_OK")
</pallas_src>

<mosaic_0001>
module attributes {stable_mosaic.version = 11 : i64} {
  func.func @encoder_layer_kernel(%arg0: i32, %arg1: i32, %arg2: memref<1x8x32xf32, #tpu.memory_space<vmem>>, %arg3: memref<1x16x32xbf16, #tpu.memory_space<vmem>>, %arg4: memref<32x32xbf16, #tpu.memory_space<vmem>>, %arg5: memref<1x32xf32, #tpu.memory_space<vmem>>, %arg6: memref<32x32xbf16, #tpu.memory_space<vmem>>, %arg7: memref<1x32xf32, #tpu.memory_space<vmem>>, %arg8: memref<32x32xbf16, #tpu.memory_space<vmem>>, %arg9: memref<1x32xf32, #tpu.memory_space<vmem>>, %arg10: memref<32x32xbf16, #tpu.memory_space<vmem>>, %arg11: memref<1x32xf32, #tpu.memory_space<vmem>>, %arg12: memref<32x64xbf16, #tpu.memory_space<vmem>>, %arg13: memref<1x64xf32, #tpu.memory_space<vmem>>, %arg14: memref<64x32xbf16, #tpu.memory_space<vmem>>, %arg15: memref<1x32xf32, #tpu.memory_space<vmem>>, %arg16: memref<1x32xf32, #tpu.memory_space<vmem>>, %arg17: memref<1x32xf32, #tpu.memory_space<vmem>>, %arg18: memref<1x8x32xf32, #tpu.memory_space<vmem>>, %arg19: memref<1x4x8x16xf32, #tpu.memory_space<vmem>>, %arg20: memref<4x16x8xbf16, #tpu.memory_space<vmem>>, %arg21: memref<4x16x8xbf16, #tpu.memory_space<vmem>>) attributes {dimension_semantics = [#tpu.dimension_semantics<parallel>, #tpu.dimension_semantics<arbitrary>], iteration_bounds = array<i64: 2, 2>, scalar_prefetch = 0 : i64, scratch_operands = 2 : i64, tpu.core_type = #tpu.core_type<tc>, window_params = [{transform_indices = @transform_0, window_bounds = array<i64: 1, 8, 32>}, {transform_indices = @transform_1, window_bounds = array<i64: 1, 16, 32>}, {pipeline_mode = #tpu.pipeline_mode<synchronous>, transform_indices = @transform_2, window_bounds = array<i64: 32, 32>}, {pipeline_mode = #tpu.pipeline_mode<synchronous>, transform_indices = @transform_3, window_bounds = array<i64: 1, 32>}, {pipeline_mode = #tpu.pipeline_mode<synchronous>, transform_indices = @transform_4, window_bounds = array<i64: 32, 32>}, {pipeline_mode = #tpu.pipeline_mode<synchronous>, transform_indices = @transform_5, window_bounds = array<i64: 1, 32>}, {pipeline_mode = #tpu.pipeline_mode<synchronous>, transform_indices = @transform_6, window_bounds = array<i64: 32, 32>}, {pipeline_mode = #tpu.pipeline_mode<synchronous>, transform_indices = @transform_7, window_bounds = array<i64: 1, 32>}, {pipeline_mode = #tpu.pipeline_mode<synchronous>, transform_indices = @transform_8, window_bounds = array<i64: 32, 32>}, {pipeline_mode = #tpu.pipeline_mode<synchronous>, transform_indices = @transform_9, window_bounds = array<i64: 1, 32>}, {pipeline_mode = #tpu.pipeline_mode<synchronous>, transform_indices = @transform_10, window_bounds = array<i64: 32, 64>}, {pipeline_mode = #tpu.pipeline_mode<synchronous>, transform_indices = @transform_11, window_bounds = array<i64: 1, 64>}, {pipeline_mode = #tpu.pipeline_mode<synchronous>, transform_indices = @transform_12, window_bounds = array<i64: 64, 32>}, {pipeline_mode = #tpu.pipeline_mode<synchronous>, transform_indices = @transform_13, window_bounds = array<i64: 1, 32>}, {pipeline_mode = #tpu.pipeline_mode<synchronous>, transform_indices = @transform_14, window_bounds = array<i64: 1, 32>}, {pipeline_mode = #tpu.pipeline_mode<synchronous>, transform_indices = @transform_15, window_bounds = array<i64: 1, 32>}, {transform_indices = @transform_16, window_bounds = array<i64: 1, 8, 32>}, {transform_indices = @transform_17, window_bounds = array<i64: 1, 4, 8, 16>}]} {
    %c0 = arith.constant 0 : index
    %c0_0 = arith.constant 0 : index
    %c0_1 = arith.constant 0 : index
    %0 = vector.load %arg2[%c0, %c0_0, %c0_1] : memref<1x8x32xf32, #tpu.memory_space<vmem>>, vector<1x8x32xf32>
    %1 = vector.shape_cast %0 : vector<1x8x32xf32> to vector<8x32xf32>
    %c0_i32 = arith.constant 0 : i32
    %2 = arith.cmpi eq, %arg1, %c0_i32 : i32
    %3 = arith.extui %2 : i1 to i32
    %c0_i32_2 = arith.constant 0 : i32
    %4 = arith.cmpi ne, %3, %c0_i32_2 : i32
    scf.if %4 {
      %c0_56 = arith.constant 0 : index
      %c0_57 = arith.constant 0 : index
      %c0_58 = arith.constant 0 : index
      %122 = vector.load %arg3[%c0_56, %c0_57, %c0_58] : memref<1x16x32xbf16, #tpu.memory_space<vmem>>, vector<1x16x32xbf16>
      %123 = vector.shape_cast %122 : vector<1x16x32xbf16> to vector<16x32xbf16>
      %c0_59 = arith.constant 0 : index
      %c0_60 = arith.constant 0 : index
      %124 = vector.load %arg6[%c0_59, %c0_60] : memref<32x32xbf16, #tpu.memory_space<vmem>>, vector<32x32xbf16>
      %cst_61 = arith.constant dense<0.000000e+00> : vector<16x32xf32>
      %125 = tpu.matmul %123, %124, %cst_61 {dimension_numbers = #tpu.dot_dimension_numbers<[1], [0], [0], [1], [0, 0, 1, 1], [], []>} : vector<16x32xbf16>, vector<32x32xbf16>, vector<16x32xf32> -> vector<16x32xf32>
      %c0_62 = arith.constant 0 : index
      %c0_63 = arith.constant 0 : index
      %126 = vector.load %arg7[%c0_62, %c0_63] : memref<1x32xf32, #tpu.memory_space<vmem>>, vector<1x32xf32>
      %127 = vector.broadcast %126 : vector<1x32xf32> to vector<16x32xf32>
      %128 = arith.addf %125, %127 : vector<16x32xf32>
      %c0_64 = arith.constant 0 : index
      %c0_65 = arith.constant 0 : index
      %129 = vector.load %arg8[%c0_64, %c0_65] : memref<32x32xbf16, #tpu.memory_space<vmem>>, vector<32x32xbf16>
      %cst_66 = arith.constant dense<0.000000e+00> : vector<16x32xf32>
      %130 = tpu.matmul %123, %129, %cst_66 {dimension_numbers = #tpu.dot_dimension_numbers<[1], [0], [0], [1], [0, 0, 1, 1], [], []>} : vector<16x32xbf16>, vector<32x32xbf16>, vector<16x32xf32> -> vector<16x32xf32>
      %c0_67 = arith.constant 0 : index
      %c0_68 = arith.constant 0 : index
      %131 = vector.load %arg9[%c0_67, %c0_68] : memref<1x32xf32, #tpu.memory_space<vmem>>, vector<1x32xf32>
      %132 = vector.broadcast %131 : vector<1x32xf32> to vector<16x32xf32>
      %133 = arith.addf %130, %132 : vector<16x32xf32>
      %134 = vector.extract_strided_slice %128 {offsets = [0, 0], sizes = [16, 8], strides = [1, 1]} : vector<16x32xf32> to vector<16x8xf32>
      %135 = arith.truncf %134 : vector<16x8xf32> to vector<16x8xbf16>
      %c0_69 = arith.constant 0 : index
      %c0_70 = arith.constant 0 : index
      %c0_71 = arith.constant 0 : index
      %136 = vector.load %arg20[%c0_69, %c0_70, %c0_71] : memref<4x16x8xbf16, #tpu.memory_space<vmem>>, vector<1x16x8xbf16>
      %137 = vector.shape_cast %136 : vector<1x16x8xbf16> to vector<16x8xbf16>
      %138 = vector.shape_cast %135 : vector<16x8xbf16> to vector<1x16x8xbf16>
      tpu.vector_store %arg20[%c0_69, %c0_70, %c0_71], %138 {strides = array<i32>} : memref<4x16x8xbf16, #tpu.memory_space<vmem>>, vector<1x16x8xbf16>,
      %139 = vector.extract_strided_slice %133 {offsets = [0, 0], sizes = [16, 8], strides = [1, 1]} : vector<16x32xf32> to vector<16x8xf32>
      %140 = arith.truncf %139 : vector<16x8xf32> to vector<16x8xbf16>
      %c0_72 = arith.constant 0 : index
      %c0_73 = arith.constant 0 : index
      %c0_74 = arith.constant 0 : index
      %141 = vector.load %arg21[%c0_72, %c0_73, %c0_74] : memref<4x16x8xbf16, #tpu.memory_space<vmem>>, vector<1x16x8xbf16>
      %142 = vector.shape_cast %141 : vector<1x16x8xbf16> to vector<16x8xbf16>
      %143 = vector.shape_cast %140 : vector<16x8xbf16> to vector<1x16x8xbf16>
      tpu.vector_store %arg21[%c0_72, %c0_73, %c0_74], %143 {strides = array<i32>} : memref<4x16x8xbf16, #tpu.memory_space<vmem>>, vector<1x16x8xbf16>,
      %144 = vector.extract_strided_slice %128 {offsets = [0, 8], sizes = [16, 8], strides = [1, 1]} : vector<16x32xf32> to vector<16x8xf32>
      %145 = arith.truncf %144 : vector<16x8xf32> to vector<16x8xbf16>
      %c1 = arith.constant 1 : index
      %c0_75 = arith.constant 0 : index
      %c0_76 = arith.constant 0 : index
      %146 = vector.load %arg20[%c1, %c0_75, %c0_76] : memref<4x16x8xbf16, #tpu.memory_space<vmem>>, vector<1x16x8xbf16>
      %147 = vector.shape_cast %146 : vector<1x16x8xbf16> to vector<16x8xbf16>
      %148 = vector.shape_cast %145 : vector<16x8xbf16> to vector<1x16x8xbf16>
      tpu.vector_store %arg20[%c1, %c0_75, %c0_76], %148 {strides = array<i32>} : memref<4x16x8xbf16, #tpu.memory_space<vmem>>, vector<1x16x8xbf16>,
      %149 = vector.extract_strided_slice %133 {offsets = [0, 8], sizes = [16, 8], strides = [1, 1]} : vector<16x32xf32> to vector<16x8xf32>
      %150 = arith.truncf %149 : vector<16x8xf32> to vector<16x8xbf16>
      %c1_77 = arith.constant 1 : index
      %c0_78 = arith.constant 0 : index
      %c0_79 = arith.constant 0 : index
      %151 = vector.load %arg21[%c1_77, %c0_78, %c0_79] : memref<4x16x8xbf16, #tpu.memory_space<vmem>>, vector<1x16x8xbf16>
      %152 = vector.shape_cast %151 : vector<1x16x8xbf16> to vector<16x8xbf16>
      %153 = vector.shape_cast %150 : vector<16x8xbf16> to vector<1x16x8xbf16>
      tpu.vector_store %arg21[%c1_77, %c0_78, %c0_79], %153 {strides = array<i32>} : memref<4x16x8xbf16, #tpu.memory_space<vmem>>, vector<1x16x8xbf16>,
      %154 = vector.extract_strided_slice %128 {offsets = [0, 16], sizes = [16, 8], strides = [1, 1]} : vector<16x32xf32> to vector<16x8xf32>
      %155 = arith.truncf %154 : vector<16x8xf32> to vector<16x8xbf16>
      %c2 = arith.constant 2 : index
      %c0_80 = arith.constant 0 : index
      %c0_81 = arith.constant 0 : index
      %156 = vector.load %arg20[%c2, %c0_80, %c0_81] : memref<4x16x8xbf16, #tpu.memory_space<vmem>>, vector<1x16x8xbf16>
      %157 = vector.shape_cast %156 : vector<1x16x8xbf16> to vector<16x8xbf16>
      %158 = vector.shape_cast %155 : vector<16x8xbf16> to vector<1x16x8xbf16>
      tpu.vector_store %arg20[%c2, %c0_80, %c0_81], %158 {strides = array<i32>} : memref<4x16x8xbf16, #tpu.memory_space<vmem>>, vector<1x16x8xbf16>,
      %159 = vector.extract_strided_slice %133 {offsets = [0, 16], sizes = [16, 8], strides = [1, 1]} : vector<16x32xf32> to vector<16x8xf32>
      %160 = arith.truncf %159 : vector<16x8xf32> to vector<16x8xbf16>
      %c2_82 = arith.constant 2 : index
      %c0_83 = arith.constant 0 : index
      %c0_84 = arith.constant 0 : index
      %161 = vector.load %arg21[%c2_82, %c0_83, %c0_84] : memref<4x16x8xbf16, #tpu.memory_space<vmem>>, vector<1x16x8xbf16>
      %162 = vector.shape_cast %161 : vector<1x16x8xbf16> to vector<16x8xbf16>
      %163 = vector.shape_cast %160 : vector<16x8xbf16> to vector<1x16x8xbf16>
      tpu.vector_store %arg21[%c2_82, %c0_83, %c0_84], %163 {strides = array<i32>} : memref<4x16x8xbf16, #tpu.memory_space<vmem>>, vector<1x16x8xbf16>,
      %164 = vector.extract_strided_slice %128 {offsets = [0, 24], sizes = [16, 8], strides = [1, 1]} : vector<16x32xf32> to vector<16x8xf32>
      %165 = arith.truncf %164 : vector<16x8xf32> to vector<16x8xbf16>
      %c3 = arith.constant 3 : index
      %c0_85 = arith.constant 0 : index
      %c0_86 = arith.constant 0 : index
      %166 = vector.load %arg20[%c3, %c0_85, %c0_86] : memref<4x16x8xbf16, #tpu.memory_space<vmem>>, vector<1x16x8xbf16>
      %167 = vector.shape_cast %166 : vector<1x16x8xbf16> to vector<16x8xbf16>
      %168 = vector.shape_cast %165 : vector<16x8xbf16> to vector<1x16x8xbf16>
      tpu.vector_store %arg20[%c3, %c0_85, %c0_86], %168 {strides = array<i32>} : memref<4x16x8xbf16, #tpu.memory_space<vmem>>, vector<1x16x8xbf16>,
      %169 = vector.extract_strided_slice %133 {offsets = [0, 24], sizes = [16, 8], strides = [1, 1]} : vector<16x32xf32> to vector<16x8xf32>
      %170 = arith.truncf %169 : vector<16x8xf32> to vector<16x8xbf16>
      %c3_87 = arith.constant 3 : index
      %c0_88 = arith.constant 0 : index
      %c0_89 = arith.constant 0 : index
      %171 = vector.load %arg21[%c3_87, %c0_88, %c0_89] : memref<4x16x8xbf16, #tpu.memory_space<vmem>>, vector<1x16x8xbf16>
      %172 = vector.shape_cast %171 : vector<1x16x8xbf16> to vector<16x8xbf16>
      %173 = vector.shape_cast %170 : vector<16x8xbf16> to vector<1x16x8xbf16>
      tpu.vector_store %arg21[%c3_87, %c0_88, %c0_89], %173 {strides = array<i32>} : memref<4x16x8xbf16, #tpu.memory_space<vmem>>, vector<1x16x8xbf16>,
    } else {
    }
    %5 = arith.truncf %1 : vector<8x32xf32> to vector<8x32xbf16>
    %c0_3 = arith.constant 0 : index
    %c0_4 = arith.constant 0 : index
    %6 = vector.load %arg4[%c0_3, %c0_4] : memref<32x32xbf16, #tpu.memory_space<vmem>>, vector<32x32xbf16>
    %cst = arith.constant dense<0.000000e+00> : vector<8x32xf32>
    %7 = tpu.matmul %5, %6, %cst {dimension_numbers = #tpu.dot_dimension_numbers<[1], [0], [0], [1], [0, 0, 1, 1], [], []>} : vector<8x32xbf16>, vector<32x32xbf16>, vector<8x32xf32> -> vector<8x32xf32>
    %c0_5 = arith.constant 0 : index
    %c0_6 = arith.constant 0 : index
    %8 = vector.load %arg5[%c0_5, %c0_6] : memref<1x32xf32, #tpu.memory_space<vmem>>, vector<1x32xf32>
    %9 = vector.broadcast %8 : vector<1x32xf32> to vector<8x32xf32>
    %10 = arith.addf %7, %9 : vector<8x32xf32>
    %cst_7 = arith.constant 0.353553385 : f32
    %11 = vector.broadcast %cst_7 : f32 to vector<8x32xf32>
    %12 = arith.mulf %10, %11 : vector<8x32xf32>
    %13 = arith.truncf %12 : vector<8x32xf32> to vector<8x32xbf16>
    %14 = vector.extract_strided_slice %13 {offsets = [0, 0], sizes = [8, 8], strides = [1, 1]} : vector<8x32xbf16> to vector<8x8xbf16>
    %15 = vector.extract_strided_slice %13 {offsets = [0, 8], sizes = [8, 8], strides = [1, 1]} : vector<8x32xbf16> to vector<8x8xbf16>
    %16 = vector.extract_strided_slice %13 {offsets = [0, 16], sizes = [8, 8], strides = [1, 1]} : vector<8x32xbf16> to vector<8x8xbf16>
    %17 = vector.extract_strided_slice %13 {offsets = [0, 24], sizes = [8, 8], strides = [1, 1]} : vector<8x32xbf16> to vector<8x8xbf16>
    %18 = vector.shape_cast %14 : vector<8x8xbf16> to vector<1x8x8xbf16>
    %19 = vector.shape_cast %15 : vector<8x8xbf16> to vector<1x8x8xbf16>
    %20 = vector.shape_cast %16 : vector<8x8xbf16> to vector<1x8x8xbf16>
    %21 = vector.shape_cast %17 : vector<8x8xbf16> to vector<1x8x8xbf16>
    %22 = tpu.concatenate %18, %19, %20, %21 in 0 : vector<1x8x8xbf16>, vector<1x8x8xbf16>, vector<1x8x8xbf16>, vector<1x8x8xbf16> -> vector<4x8x8xbf16>
    %c0_8 = arith.constant 0 : index
    %c0_9 = arith.constant 0 : index
    %c0_10 = arith.constant 0 : index
    %23 = vector.load %arg20[%c0_8, %c0_9, %c0_10] : memref<4x16x8xbf16, #tpu.memory_space<vmem>>, vector<4x16x8xbf16>
    %c0_11 = arith.constant 0 : index
    %c0_12 = arith.constant 0 : index
    %c0_13 = arith.constant 0 : index
    %24 = vector.load %arg21[%c0_11, %c0_12, %c0_13] : memref<4x16x8xbf16, #tpu.memory_space<vmem>>, vector<4x16x8xbf16>
    "tpu.trace_start"() <{level = 10 : i32, message = "hqd,hkd->hqk"}> : () -> ()
    %cst_14 = arith.constant dense<0.000000e+00> : vector<4x8x16xf32>
    %25 = tpu.matmul %22, %23, %cst_14 {dimension_numbers = #tpu.dot_dimension_numbers<[2], [2], [1], [1], [0, 0, 0, 1, 1, 1], [0], [0]>} : vector<4x8x8xbf16>, vector<4x16x8xbf16>, vector<4x8x16xf32> -> vector<4x8x16xf32>
    "tpu.trace_stop"() : () -> ()
    %cst_15 = arith.constant dense<0xFF800000> : vector<4x8xf32>
    %26 = vector.multi_reduction <maximumf>, %25, %cst_15 [2] : vector<4x8x16xf32> to vector<4x8xf32>
    %27 = vector.shape_cast %26 : vector<4x8xf32> to vector<4x8x1xf32>
    %28 = vector.broadcast %27 : vector<4x8x1xf32> to vector<4x8x16xf32>
    %29 = arith.subf %25, %28 : vector<4x8x16xf32>
    %30 = math.exp %29 : vector<4x8x16xf32>
    %cst_16 = arith.constant dense<0.000000e+00> : vector<4x8xf32>
    %31 = vector.multi_reduction <add>, %30, %cst_16 [2] : vector<4x8x16xf32> to vector<4x8xf32>
    %32 = vector.shape_cast %31 : vector<4x8xf32> to vector<4x8x1xf32>
    %cst_17 = arith.constant 1.000000e+00 : f32
    %33 = vector.broadcast %cst_17 : f32 to vector<4x8x1xf32>
    %34 = arith.divf %33, %32 : vector<4x8x1xf32>
    %35 = vector.broadcast %34 : vector<4x8x1xf32> to vector<4x8x16xf32>
    %36 = arith.mulf %30, %35 : vector<4x8x16xf32>
    %37 = arith.truncf %36 : vector<4x8x16xf32> to vector<4x8x16xbf16>
    %c0_18 = arith.constant 0 : index
    %c0_19 = arith.constant 0 : index
    %c0_20 = arith.constant 0 : index
    %c0_21 = arith.constant 0 : index
    %38 = vector.load %arg19[%c0_18, %c0_19, %c0_20, %c0_21] : memref<1x4x8x16xf32, #tpu.memory_space<vmem>>, vector<1x4x8x16xf32>
    %39 = vector.shape_cast %38 : vector<1x4x8x16xf32> to vector<4x8x16xf32>
    %40 = vector.shape_cast %36 : vector<4x8x16xf32> to vector<1x4x8x16xf32>
    tpu.vector_store %arg19[%c0_18, %c0_19, %c0_20, %c0_21], %40 {strides = array<i32>} : memref<1x4x8x16xf32, #tpu.memory_space<vmem>>, vector<1x4x8x16xf32>,
    "tpu.trace_start"() <{level = 10 : i32, message = "hqk,hkd->hqd"}> : () -> ()
    %cst_22 = arith.constant dense<0.000000e+00> : vector<4x8x8xf32>
    %41 = tpu.matmul %37, %24, %cst_22 {dimension_numbers = #tpu.dot_dimension_numbers<[2], [1], [1], [2], [0, 0, 0, 1, 1, 2], [0], [0]>} : vector<4x8x16xbf16>, vector<4x16x8xbf16>, vector<4x8x8xf32> -> vector<4x8x8xf32>
    "tpu.trace_stop"() : () -> ()
    %42 = arith.truncf %41 : vector<4x8x8xf32> to vector<4x8x8xbf16>
    %43 = vector.extract_strided_slice %42 {offsets = [0, 0, 0], sizes = [1, 8, 8], strides = [1, 1, 1]} : vector<4x8x8xbf16> to vector<1x8x8xbf16>
    %44 = vector.shape_cast %43 : vector<1x8x8xbf16> to vector<8x8xbf16>
    %45 = vector.extract_strided_slice %42 {offsets = [1, 0, 0], sizes = [1, 8, 8], strides = [1, 1, 1]} : vector<4x8x8xbf16> to vector<1x8x8xbf16>
    %46 = vector.shape_cast %45 : vector<1x8x8xbf16> to vector<8x8xbf16>
    %47 = vector.extract_strided_slice %42 {offsets = [2, 0, 0], sizes = [1, 8, 8], strides = [1, 1, 1]} : vector<4x8x8xbf16> to vector<1x8x8xbf16>
    %48 = vector.shape_cast %47 : vector<1x8x8xbf16> to vector<8x8xbf16>
    %49 = vector.extract_strided_slice %42 {offsets = [3, 0, 0], sizes = [1, 8, 8], strides = [1, 1, 1]} : vector<4x8x8xbf16> to vector<1x8x8xbf16>
    %50 = vector.shape_cast %49 : vector<1x8x8xbf16> to vector<8x8xbf16>
    %51 = tpu.concatenate %44, %46, %48, %50 in 1 : vector<8x8xbf16>, vector<8x8xbf16>, vector<8x8xbf16>, vector<8x8xbf16> -> vector<8x32xbf16>
    %c0_23 = arith.constant 0 : index
    %c0_24 = arith.constant 0 : index
    %52 = vector.load %arg10[%c0_23, %c0_24] : memref<32x32xbf16, #tpu.memory_space<vmem>>, vector<32x32xbf16>
    %cst_25 = arith.constant dense<0.000000e+00> : vector<8x32xf32>
    %53 = tpu.matmul %51, %52, %cst_25 {dimension_numbers = #tpu.dot_dimension_numbers<[1], [0], [0], [1], [0, 0, 1, 1], [], []>} : vector<8x32xbf16>, vector<32x32xbf16>, vector<8x32xf32> -> vector<8x32xf32>
    %c0_26 = arith.constant 0 : index
    %c0_27 = arith.constant 0 : index
    %54 = vector.load %arg11[%c0_26, %c0_27] : memref<1x32xf32, #tpu.memory_space<vmem>>, vector<1x32xf32>
    %55 = vector.broadcast %54 : vector<1x32xf32> to vector<8x32xf32>
    %56 = arith.addf %53, %55 : vector<8x32xf32>
    %c0_28 = arith.constant 0 : index
    %c0_29 = arith.constant 0 : index
    %57 = vector.load %arg16[%c0_28, %c0_29] : memref<1x32xf32, #tpu.memory_space<vmem>>, vector<1x32xf32>
    %c0_30 = arith.constant 0 : index
    %c0_31 = arith.constant 0 : index
    %58 = vector.load %arg17[%c0_30, %c0_31] : memref<1x32xf32, #tpu.memory_space<vmem>>, vector<1x32xf32>
    %59 = arith.addf %1, %56 : vector<8x32xf32>
    %cst_32 = arith.constant dense<0.000000e+00> : vector<8xf32>
    %60 = vector.multi_reduction <add>, %59, %cst_32 [1] : vector<8x32xf32> to vector<8xf32>
    %61 = vector.shape_cast %60 : vector<8xf32> to vector<8x1xf32>
    %cst_33 = arith.constant 3.200000e+01 : f32
    %62 = vector.broadcast %cst_33 : f32 to vector<8x1xf32>
    %63 = arith.divf %61, %62 : vector<8x1xf32>
    %64 = vector.broadcast %63 : vector<8x1xf32> to vector<8x32xf32>
    %65 = arith.subf %59, %64 : vector<8x32xf32>
    %66 = arith.mulf %65, %65 : vector<8x32xf32>
    %cst_34 = arith.constant dense<0.000000e+00> : vector<8xf32>
    %67 = vector.multi_reduction <add>, %66, %cst_34 [1] : vector<8x32xf32> to vector<8xf32>
    %68 = vector.shape_cast %67 : vector<8xf32> to vector<8x1xf32>
    %cst_35 = arith.constant 3.200000e+01 : f32
    %69 = vector.broadcast %cst_35 : f32 to vector<8x1xf32>
    %70 = arith.divf %68, %69 : vector<8x1xf32>
    %71 = vector.broadcast %63 : vector<8x1xf32> to vector<8x32xf32>
    %72 = arith.subf %59, %71 : vector<8x32xf32>
    %cst_36 = arith.constant 9.99999997E-7 : f32
    %73 = vector.broadcast %cst_36 : f32 to vector<8x1xf32>
    %74 = arith.addf %70, %73 : vector<8x1xf32>
    %75 = math.rsqrt %74 : vector<8x1xf32>
    %76 = vector.broadcast %75 : vector<8x1xf32> to vector<8x32xf32>
    %77 = arith.mulf %72, %76 : vector<8x32xf32>
    %78 = vector.broadcast %57 : vector<1x32xf32> to vector<8x32xf32>
    %79 = arith.mulf %77, %78 : vector<8x32xf32>
    %80 = vector.broadcast %58 : vector<1x32xf32> to vector<8x32xf32>
    %81 = arith.addf %79, %80 : vector<8x32xf32>
    %82 = arith.truncf %81 : vector<8x32xf32> to vector<8x32xbf16>
    %c0_37 = arith.constant 0 : index
    %c0_38 = arith.constant 0 : index
    %83 = vector.load %arg12[%c0_37, %c0_38] : memref<32x64xbf16, #tpu.memory_space<vmem>>, vector<32x64xbf16>
    %cst_39 = arith.constant dense<0.000000e+00> : vector<8x64xf32>
    %84 = tpu.matmul %82, %83, %cst_39 {dimension_numbers = #tpu.dot_dimension_numbers<[1], [0], [0], [1], [0, 0, 1, 1], [], []>} : vector<8x32xbf16>, vector<32x64xbf16>, vector<8x64xf32> -> vector<8x64xf32>
    %c0_40 = arith.constant 0 : index
    %c0_41 = arith.constant 0 : index
    %85 = vector.load %arg13[%c0_40, %c0_41] : memref<1x64xf32, #tpu.memory_space<vmem>>, vector<1x64xf32>
    %86 = vector.broadcast %85 : vector<1x64xf32> to vector<8x64xf32>
    %87 = arith.addf %84, %86 : vector<8x64xf32>
    %cst_42 = arith.constant 0.000000e+00 : f32
    %88 = vector.broadcast %cst_42 : f32 to vector<8x64xf32>
    %89 = arith.maximumf %87, %88 : vector<8x64xf32>
    %90 = arith.truncf %89 : vector<8x64xf32> to vector<8x64xbf16>
    %c0_43 = arith.constant 0 : index
    %c0_44 = arith.constant 0 : index
    %91 = vector.load %arg14[%c0_43, %c0_44] : memref<64x32xbf16, #tpu.memory_space<vmem>>, vector<64x32xbf16>
    %cst_45 = arith.constant dense<0.000000e+00> : vector<8x32xf32>
    %92 = tpu.matmul %90, %91, %cst_45 {dimension_numbers = #tpu.dot_dimension_numbers<[1], [0], [0], [1], [0, 0, 1, 1], [], []>} : vector<8x64xbf16>, vector<64x32xbf16>, vector<8x32xf32> -> vector<8x32xf32>
    %c0_46 = arith.constant 0 : index
    %c0_47 = arith.constant 0 : index
    %93 = vector.load %arg15[%c0_46, %c0_47] : memref<1x32xf32, #tpu.memory_space<vmem>>, vector<1x32xf32>
    %94 = vector.broadcast %93 : vector<1x32xf32> to vector<8x32xf32>
    %95 = arith.addf %92, %94 : vector<8x32xf32>
    %96 = arith.addf %81, %95 : vector<8x32xf32>
    %cst_48 = arith.constant dense<0.000000e+00> : vector<8xf32>
    %97 = vector.multi_reduction <add>, %96, %cst_48 [1] : vector<8x32xf32> to vector<8xf32>
    %98 = vector.shape_cast %97 : vector<8xf32> to vector<8x1xf32>
    %cst_49 = arith.constant 3.200000e+01 : f32
    %99 = vector.broadcast %cst_49 : f32 to vector<8x1xf32>
    %100 = arith.divf %98, %99 : vector<8x1xf32>
    %101 = vector.broadcast %100 : vector<8x1xf32> to vector<8x32xf32>
    %102 = arith.subf %96, %101 : vector<8x32xf32>
    %103 = arith.mulf %102, %102 : vector<8x32xf32>
    %cst_50 = arith.constant dense<0.000000e+00> : vector<8xf32>
    %104 = vector.multi_reduction <add>, %103, %cst_50 [1] : vector<8x32xf32> to vector<8xf32>
    %105 = vector.shape_cast %104 : vector<8xf32> to vector<8x1xf32>
    %cst_51 = arith.constant 3.200000e+01 : f32
    %106 = vector.broadcast %cst_51 : f32 to vector<8x1xf32>
    %107 = arith.divf %105, %106 : vector<8x1xf32>
    %108 = vector.broadcast %100 : vector<8x1xf32> to vector<8x32xf32>
    %109 = arith.subf %96, %108 : vector<8x32xf32>
    %cst_52 = arith.constant 9.99999997E-7 : f32
    %110 = vector.broadcast %cst_52 : f32 to vector<8x1xf32>
    %111 = arith.addf %107, %110 : vector<8x1xf32>
    %112 = math.rsqrt %111 : vector<8x1xf32>
    %113 = vector.broadcast %112 : vector<8x1xf32> to vector<8x32xf32>
    %114 = arith.mulf %109, %113 : vector<8x32xf32>
    %115 = vector.broadcast %57 : vector<1x32xf32> to vector<8x32xf32>
    %116 = arith.mulf %114, %115 : vector<8x32xf32>
    %117 = vector.broadcast %58 : vector<1x32xf32> to vector<8x32xf32>
    %118 = arith.addf %116, %117 : vector<8x32xf32>
    %c0_53 = arith.constant 0 : index
    %c0_54 = arith.constant 0 : index
    %c0_55 = arith.constant 0 : index
    %119 = vector.load %arg18[%c0_53, %c0_54, %c0_55] : memref<1x8x32xf32, #tpu.memory_space<vmem>>, vector<1x8x32xf32>
    %120 = vector.shape_cast %119 : vector<1x8x32xf32> to vector<8x32xf32>
    %121 = vector.shape_cast %118 : vector<8x32xf32> to vector<1x8x32xf32>
    tpu.vector_store %arg18[%c0_53, %c0_54, %c0_55], %121 {strides = array<i32>} : memref<1x8x32xf32, #tpu.memory_space<vmem>>, vector<1x8x32xf32>,
    return
  }
  func.func @transform_0(%arg0: i32, %arg1: i32) -> (i32, i32, i32) {
    %c0_i32 = arith.constant 0 : i32
    %c0_i32_0 = arith.constant 0 : i32
    return %arg0, %arg1, %c0_i32 : i32, i32, i32
  }
  func.func @transform_1(%arg0: i32, %arg1: i32) -> (i32, i32, i32) {
    %c0_i32 = arith.constant 0 : i32
    %c0_i32_0 = arith.constant 0 : i32
    %c0_i32_1 = arith.constant 0 : i32
    return %arg0, %c0_i32, %c0_i32_0 : i32, i32, i32
  }
  func.func @transform_2(%arg0: i32, %arg1: i32) -> (i32, i32) {
    %c0_i32 = arith.constant 0 : i32
    %c0_i32_0 = arith.constant 0 : i32
    %c0_i32_1 = arith.constant 0 : i32
    return %c0_i32, %c0_i32_0 : i32, i32
  }
  func.func @transform_3(%arg0: i32, %arg1: i32) -> (i32, i32) {
    %c0_i32 = arith.constant 0 : i32
    %c0_i32_0 = arith.constant 0 : i32
    %c0_i32_1 = arith.constant 0 : i32
    return %c0_i32, %c0_i32_0 : i32, i32
  }
  func.func @transform_4(%arg0: i32, %arg1: i32) -> (i32, i32) {
    %c0_i32 = arith.constant 0 : i32
    %c0_i32_0 = arith.constant 0 : i32
    %c0_i32_1 = arith.constant 0 : i32
    return %c0_i32, %c0_i32_0 : i32, i32
  }
  func.func @transform_5(%arg0: i32, %arg1: i32) -> (i32, i32) {
    %c0_i32 = arith.constant 0 : i32
    %c0_i32_0 = arith.constant 0 : i32
    %c0_i32_1 = arith.constant 0 : i32
    return %c0_i32, %c0_i32_0 : i32, i32
  }
  func.func @transform_6(%arg0: i32, %arg1: i32) -> (i32, i32) {
    %c0_i32 = arith.constant 0 : i32
    %c0_i32_0 = arith.constant 0 : i32
    %c0_i32_1 = arith.constant 0 : i32
    return %c0_i32, %c0_i32_0 : i32, i32
  }
  func.func @transform_7(%arg0: i32, %arg1: i32) -> (i32, i32) {
    %c0_i32 = arith.constant 0 : i32
    %c0_i32_0 = arith.constant 0 : i32
    %c0_i32_1 = arith.constant 0 : i32
    return %c0_i32, %c0_i32_0 : i32, i32
  }
  func.func @transform_8(%arg0: i32, %arg1: i32) -> (i32, i32) {
    %c0_i32 = arith.constant 0 : i32
    %c0_i32_0 = arith.constant 0 : i32
    %c0_i32_1 = arith.constant 0 : i32
    return %c0_i32, %c0_i32_0 : i32, i32
  }
  func.func @transform_9(%arg0: i32, %arg1: i32) -> (i32, i32) {
    %c0_i32 = arith.constant 0 : i32
    %c0_i32_0 = arith.constant 0 : i32
    %c0_i32_1 = arith.constant 0 : i32
    return %c0_i32, %c0_i32_0 : i32, i32
  }
  func.func @transform_10(%arg0: i32, %arg1: i32) -> (i32, i32) {
    %c0_i32 = arith.constant 0 : i32
    %c0_i32_0 = arith.constant 0 : i32
    %c0_i32_1 = arith.constant 0 : i32
    return %c0_i32, %c0_i32_0 : i32, i32
  }
  func.func @transform_11(%arg0: i32, %arg1: i32) -> (i32, i32) {
    %c0_i32 = arith.constant 0 : i32
    %c0_i32_0 = arith.constant 0 : i32
    %c0_i32_1 = arith.constant 0 : i32
    return %c0_i32, %c0_i32_0 : i32, i32
  }
  func.func @transform_12(%arg0: i32, %arg1: i32) -> (i32, i32) {
    %c0_i32 = arith.constant 0 : i32
    %c0_i32_0 = arith.constant 0 : i32
    %c0_i32_1 = arith.constant 0 : i32
    return %c0_i32, %c0_i32_0 : i32, i32
  }
  func.func @transform_13(%arg0: i32, %arg1: i32) -> (i32, i32) {
    %c0_i32 = arith.constant 0 : i32
    %c0_i32_0 = arith.constant 0 : i32
    %c0_i32_1 = arith.constant 0 : i32
    return %c0_i32, %c0_i32_0 : i32, i32
  }
  func.func @transform_14(%arg0: i32, %arg1: i32) -> (i32, i32) {
    %c0_i32 = arith.constant 0 : i32
    %c0_i32_0 = arith.constant 0 : i32
    %c0_i32_1 = arith.constant 0 : i32
    return %c0_i32, %c0_i32_0 : i32, i32
  }
  func.func @transform_15(%arg0: i32, %arg1: i32) -> (i32, i32) {
    %c0_i32 = arith.constant 0 : i32
    %c0_i32_0 = arith.constant 0 : i32
    %c0_i32_1 = arith.constant 0 : i32
    return %c0_i32, %c0_i32_0 : i32, i32
  }
  func.func @transform_16(%arg0: i32, %arg1: i32) -> (i32, i32, i32) {
    %c0_i32 = arith.constant 0 : i32
    %c0_i32_0 = arith.constant 0 : i32
    return %arg0, %arg1, %c0_i32 : i32, i32, i32
  }
  func.func @transform_17(%arg0: i32, %arg1: i32) -> (i32, i32, i32, i32) {
    %c0_i32 = arith.constant 0 : i32
    %c0_i32_0 = arith.constant 0 : i32
    %c0_i32_1 = arith.constant 0 : i32
    return %arg0, %c0_i32, %arg1, %c0_i32_0 : i32, i32, i32, i32
  }
}

</mosaic_0001>

<bundles_post_ra>
// kernel: tpu_custom_call.1
= control target key start
LH: loop header
LB: loop body
LE: loop exit
PB: predicated region body
PF: predicated region fallthrough
CT: control target
= control target key end

     0   :  { %s4211_s0 = inlined_call_operand.hbm [shape: f32[2,16,32], index: 0, kind: input, shape index: {}]   ;;  %s4212_s1 = inlined_call_operand.hbm [shape: bf16[2,16,32], index: 1, kind: input, shape index: {}]   ;;  %s4213_s2 = inlined_call_operand.hbm [shape: bf16[32,32], index: 2, kind: input, shape index: {}]   ;;  %s4214_s3 = inlined_call_operand.hbm [shape: f32[1,32], index: 3, kind: input, shape index: {}]   ;;  %s4215_s4 = inlined_call_operand.hbm [shape: bf16[32,32], index: 4, kind: input, shape index: {}]   ;;  %s4216_s5 = inlined_call_operand.hbm [shape: f32[1,32], index: 5, kind: input, shape index: {}]   ;;  %s4217_s6 = inlined_call_operand.hbm [shape: bf16[32,32], index: 6, kind: input, shape index: {}]   ;;  %s4218_s7 = inlined_call_operand.hbm [shape: f32[1,32], index: 7, kind: input, shape index: {}]   ;;  %s4219_s8 = inlined_call_operand.hbm [shape: bf16[32,32], index: 8, kind: input, shape index: {}]   ;;  %s4220_s9 = inlined_call_operand.hbm [shape: f32[1,32], index: 9, kind: input, shape index: {}]   ;;  %s4221_s10 = inlined_call_operand.hbm [shape: bf16[32,64], index: 10, kind: input, shape index: {}]   ;;  %s4222_s11 = inlined_call_operand.hbm [shape: f32[1,64], index: 11, kind: input, shape index: {}]   ;;  %s4223_s12 = inlined_call_operand.hbm [shape: bf16[64,32], index: 12, kind: input, shape index: {}]   ;;  %s4224_s13 = inlined_call_operand.hbm [shape: f32[1,32], index: 13, kind: input, shape index: {}]   ;;  %s4225_s14 = inlined_call_operand.hbm [shape: f32[1,32], index: 14, kind: input, shape index: {}]   ;;  %s4226_s15 = inlined_call_operand.hbm [shape: f32[1,32], index: 15, kind: input, shape index: {}]   ;;  %s4227_s16 = inlined_call_operand.hbm [shape: f32[2,16,32], index: 16, kind: output, shape index: {0}]   ;;  %s4228_s17 = inlined_call_operand.hbm [shape: f32[2,4,16,16], index: 17, kind: output, shape index: {1}]  }
   0x1   :  { %4254 = sst [smem:[#allocation57_spill]] %s4211_s0 }
   0x2   :  { %4255 = sst [smem:[#allocation58_spill]] %s4212_s1 }
   0x3   :  { %4256 = sst [smem:[#allocation59_spill]] %s4213_s2 }
   0x4   :  { %4257 = sst [smem:[#allocation60_spill]] %s4214_s3 }
   0x5   :  { %4258 = sst [smem:[#allocation61_spill]] %s4215_s4 }
   0x6   :  { %4259 = sst [smem:[#allocation62_spill]] %s4216_s5 }
   0x7   :  { %4260 = sst [smem:[#allocation63_spill]] %s4217_s6 }
   0x8   :  { %4261 = sst [smem:[#allocation64_spill]] %s4218_s7 }
   0x9   :  { %4262 = sst [smem:[#allocation65_spill]] %s4219_s8 }
   0xa   :  { %4263 = sst [smem:[#allocation66_spill]] %s4220_s9 }
   0xb   :  { %4264 = sst [smem:[#allocation67_spill]] %s4221_s10 }
   0xc   :  { %4265 = sst [smem:[#allocation68_spill]] %s4222_s11 }
   0xd   :  { %4266 = sst [smem:[#allocation69_spill]] %s4223_s12 }
   0xe   :  { %4267 = sst [smem:[#allocation70_spill]] %s4224_s13 }
   0xf   :  { %4268 = sst [smem:[#allocation71_spill]] %s4227_s16 }
  0x10   :  { %4269 = sst [smem:[#allocation72_spill]] %s4228_s17 }
  0x11   :  { %23 = vsyncpa [#allocation5], 0 }
  0x12   :  { %25 = vsyncpa [#allocation5 + $0x1], 0 }
  0x13   :  { %26 = vsyncpa [#allocation8], 0 }
  0x14   :  { %28 = vsyncpa [#allocation8 + $0x1], 0 }
  0x15   :  { %29 = vsyncpa [#allocation11], 0 }
  0x16   :  { %30 = vsyncpa [#allocation14], 0 }
  0x17   :  { %31 = vsyncpa [#allocation17], 0 }
  0x18   :  { %32 = vsyncpa [#allocation20], 0 }
  0x19   :  { %33 = vsyncpa [#allocation23], 0 }
  0x1a   :  { %34 = vsyncpa [#allocation26], 0 }
  0x1b   :  { %35 = vsyncpa [#allocation29], 0 }
  0x1c   :  { %36 = vsyncpa [#allocation6], 0 }
  0x1d   :  { %38 = vsyncpa [#allocation6 + $0x1], 0 }
  0x1e   :  { %39 = vsyncpa [#allocation32], 0 }
  0x1f   :  { %41 = vsyncpa [#allocation32 + $0x1], 0  ;;  %s3402_s24 = smov 0   ;;  %s3404_s25 = smov 0  }
  0x20   :  { %s3406_s26 = smov 0   ;;  %s3408_s27 = smov 0  }
  0x21   :  { %s3410_s28 = smov 0   ;;  %s3412_s29 = smov 0  }
  0x22   :  { %s3414_s0 = smov 0   ;;  %s3416_s30 = smov 0  }
  0x23   :  { %s3418_s18 = smov 0   ;;  %s3420_s19 = smov 0  }
  0x24   :  { %s3422_s1 = smov 0  }
  0x25 LB: > { %4270 = sst [smem:[#allocation45_spill]] %s3235_s24  ;;  %s3458_s20 = sadd.s32 4294967295, %s3275_s1   ;;  %s3275_s1 = sphi %s3422_s1, %s47_s1   ;;  %s3271_s19 = sphi %s3420_s19, %s4360_s19   ;;  %s3267_s18 = sphi %s3418_s18, %s4364_s18   ;;  %s3263_s30 = sphi %s3416_s30, %s4358_s30   ;;  %s3259_s0 = sphi %s3414_s0, %s4363_s0   ;;  %s3255_s29 = sphi %s3412_s29, %s4362_s29   ;;  %s3251_s28 = sphi %s3410_s28, %s4356_s28   ;;  %s3247_s27 = sphi %s3408_s27, %s4355_s27   ;;  %s3243_s26 = sphi %s3406_s26, %s4361_s26   ;;  %s3239_s25 = sphi %s3404_s25, %s4354_s25   ;;  %s3235_s24 = sphi %s3402_s24, %s4353_s24  }
  0x26   : > { %4271 = sst [smem:[#allocation46_spill]] %s3239_s25  ;;  %p2104_p0 = scmp.ge.s32.totalorder %s3275_s1, 1 }
  0x27   : > { %4272 = sst [smem:[#allocation47_spill]] %s3243_s26  ;;  %p4246_p1 = scmp.eq.s32.totalorder %s3458_s20, 0 }
  0x28   : > { %4273 = sst [smem:[#allocation48_spill]] %s3247_s27  ;;  %p468_p2 = scmp.lt.s32.totalorder %s3275_s1, 5 }
  0x29   : > { %4274 = sst [smem:[#allocation49_spill]] %s3251_s28  ;;  %s3277_s22 = smov [#allocation9]  }
  0x2a   : > { %4275 = sst [smem:[#allocation50_spill]] %s3255_s29  ;;  %p3463_p3 = pnand %p2104_p0, %p468_p2 }
  0x2b   : > { %4276 = sst [smem:[#allocation51_spill]] %s3259_s0  ;;  %s480_s23 = sshll.u32 %s3277_s22, 4  ;;  %s3467_s23 = int_to_ptr.vmem [resolvable:$true] %s480_s23 }
  0x2c   : > { %4277 = sst [smem:[#allocation52_spill]] %s3263_s30  ;;  %p2392_p4 = pneg %p3463_p3 }
  0x2d   : > { %4278 = sst [smem:[#allocation53_spill]] %s3267_s18  ;;  %s3278_s17 = smov [#allocation10]  }
  0x2e   : > { %4279 = sst [smem:[#allocation54_spill]] %s3271_s19  ;;  %p3473_p5 = pnand %p2392_p4, %p4246_p1 }
  0x2f   : > { %4280 = sst [smem:[#allocation55_spill]] %s3458_s20  ;;  %s494_s30 = sshll.u32 %s3278_s17, 4  ;;  %s3477_s30 = int_to_ptr.vmem [resolvable:$true] %s494_s30 }
  0x30   : > { %s4281_s21 = scalar_select %p3463_p3, 1, 0 }
  0x31   : > { %s3279_s0 = smov [#allocation13]   ;;  %s4284_s2 = sld [smem:[#allocation59_spill]] }
  0x32   : > { %4282 = sst [smem:[#allocation56_spill]] %s4281_s21  ;;  %s3479_s24 = sshll.u32 %s3279_s0, 4  ;;  %s519_s24 = int_to_ptr.vmem [resolvable:$true] %s3479_s24 }
  0x33   : > { %p3489_p7 = pneg %p3473_p5 }
  0x37   : > { %s2633_s22 = scalar_lea.hbm %s4284_s2, 256 }
  0x38   : > { %p2634_p6 = scmp.ne.s32.totalorder %s4284_s2, %s2633_s22  ;;  %p2640_p10 = scmp.lt.u32.totalorder %s2633_s22, %s4284_s2 }
  0x3a   : > { %p2636_p8 = pnand %p3489_p7, %p2634_p6 }
  0x3c   : > { %p2637_p9 = pneg %p2636_p8 }
  0x3e   : > { %p2642_p11 = pnand %p2640_p10, %p2637_p9 }
  0x40   : > { %2645 = shalt.err (!%p2642_p11)
}
  0x41   : > { %s2646_s25 = scalar_lea.vmem %s3467_s23, 256  ;;  %p2654_p2 = scmp.lt.s32.totalorder %s3467_s23, %s3467_s23 }
  0x42   : > { %p2647_p12 = scmp.ne.s32.totalorder %s3467_s23, %s2646_s25  ;;  %p2655_p4 = scmp.lt.s32.totalorder %s2646_s25, %s2646_s25 }
  0x44   : > { %p2649_p13 = pnand %p2647_p12, %p3489_p7  ;;  %p2656_p6 = por %p2655_p4, %p2654_p2 }
  0x46   : > { %p2650_p0 = pneg %p2649_p13 }
  0x48   : > { %p2657_p8 = pnand %p2656_p6, %p2650_p0 }
  0x4a   : > { %2660 = shalt.err (!%p2657_p8)
}
  0x4b   : > { %s4248_s26 = smov 64   ;;  %s4250_s27 = smov 4  }
  0x4c   : > { %2395 = dma.hbm_to_vmem [thread:$0]  (!%p3473_p5), %s4284_s2, 256, %s3467_s23, [#allocation8], %s4248_s26, %s4248_s26, %s4250_s27  }
  0x4d   : > { %s4286_s3 = sld [smem:[#allocation60_spill]] }
  0x53   : > { %s2661_s25 = scalar_lea.hbm %s4286_s3, 16 }
  0x54   : > { %p2662_p9 = scmp.ne.s32.totalorder %s4286_s3, %s2661_s25  ;;  %p2668_p12 = scmp.lt.u32.totalorder %s2661_s25, %s4286_s3 }
  0x56   : > { %p2664_p10 = pnand %p2662_p9, %p3489_p7 }
  0x58   : > { %p2665_p11 = pneg %p2664_p10 }
  0x5a   : > { %p2670_p13 = pnand %p2668_p12, %p2665_p11 }
  0x5c   : > { %2673 = shalt.err (!%p2670_p13)
}
  0x5d   : > { %s2674_s23 = scalar_lea.vmem %s3477_s30, 16  ;;  %s2681_s28 = scalar_lea.vmem %s3477_s30, 32 }
  0x5e   : > { %p2675_p0 = scmp.ne.s32.totalorder %s3477_s30, %s2674_s23  ;;  %p2682_p6 = scmp.lt.s32.totalorder %s3477_s30, %s3477_s30 }
  0x5f   : > { %p2683_p8 = scmp.lt.s32.totalorder %s2681_s28, %s2674_s23 }
  0x60   : > { %p2677_p2 = pnand %p2675_p0, %p3489_p7 }
  0x61   : > { %p2684_p9 = por %p2683_p8, %p2682_p6 }
  0x62   : > { %p2678_p4 = pneg %p2677_p2 }
  0x64   : > { %p2685_p10 = pnand %p2684_p9, %p2678_p4 }
  0x66   : > { %2688 = shalt.err (!%p2685_p10)
}
  0x67   : > { %2398 = dma.hbm_to_vmem [thread:$0]  (!%p3473_p5), %s4286_s3, 16, %s3477_s30, [#allocation11]  }
  0x68   : > { %s4287_s5 = sld [smem:[#allocation62_spill]] }
  0x6e   : > { %s2689_s22 = scalar_lea.hbm %s4287_s5, 16 }
  0x6f   : > { %p2690_p11 = scmp.ne.s32.totalorder %s4287_s5, %s2689_s22  ;;  %p2696_p0 = scmp.lt.u32.totalorder %s2689_s22, %s4287_s5 }
  0x71   : > { %p2692_p12 = pnand %p2690_p11, %p3489_p7 }
  0x73   : > { %p2693_p13 = pneg %p2692_p12 }
  0x75   : > { %p2698_p2 = pnand %p2696_p0, %p2693_p13 }
  0x77   : > { %2701 = shalt.err (!%p2698_p2)
}
  0x78   : > { %s2702_s28 = scalar_lea.vmem %s519_s24, 16  ;;  %s2709_s30 = scalar_lea.vmem %s519_s24, 32 }
  0x79   : > { %p2703_p4 = scmp.ne.s32.totalorder %s519_s24, %s2702_s28  ;;  %p2710_p9 = scmp.lt.s32.totalorder %s519_s24, %s519_s24 }
  0x7a   : > { %p2711_p10 = scmp.lt.s32.totalorder %s2709_s30, %s2702_s28 }
  0x7b   : > { %p2705_p6 = pnand %p2703_p4, %p3489_p7 }
  0x7c   : > { %p2712_p1 = por %p2711_p10, %p2710_p9 }
  0x7d   : > { %p2706_p8 = pneg %p2705_p6 }
  0x7f   : > { %p2713_p3 = pnand %p2712_p1, %p2706_p8 }
  0x81   : > { %2716 = shalt.err (!%p2713_p3)
}
  0x82   : > { %2404 = dma.hbm_to_vmem [thread:$0]  (!%p3473_p5), %s4287_s5, 16, %s519_s24, [#allocation14]  }
  0x83   : > { %s3282_s19 = smov [#allocation16]   ;;  %s3283_s22 = smov [#allocation19]  }
  0x84   : > { %s542_s21 = sshll.u32 %s3282_s19, 4  ;;  %s566_s17 = sshll.u32 %s3283_s22, 4  ;;  %s543_s21 = int_to_ptr.vmem [resolvable:$true] %s542_s21  ;;  %s567_s17 = int_to_ptr.vmem [resolvable:$true] %s566_s17 }
  0x85   : > { %s4288_s7 = sld [smem:[#allocation64_spill]] }
  0x8b   : > { %s2717_s23 = scalar_lea.hbm %s4288_s7, 16 }
  0x8c   : > { %p2718_p1 = scmp.ne.s32.totalorder %s4288_s7, %s2717_s23  ;;  %p2724_p12 = scmp.lt.u32.totalorder %s2717_s23, %s4288_s7 }
  0x8e   : > { %p2720_p3 = pnand %p2718_p1, %p3489_p7 }
  0x90   : > { %p2721_p11 = pneg %p2720_p3 }
  0x92   : > { %p2726_p13 = pnand %p2724_p12, %p2721_p11 }
  0x94   : > { %2729 = shalt.err (!%p2726_p13)
}
  0x95   : > { %s2730_s24 = scalar_lea.vmem %s543_s21, 16  ;;  %s2737_s18 = scalar_lea.vmem %s543_s21, 32 }
  0x96   : > { %p2731_p0 = scmp.ne.s32.totalorder %s543_s21, %s2730_s24  ;;  %p2738_p6 = scmp.lt.s32.totalorder %s543_s21, %s543_s21 }
  0x97   : > { %p2739_p8 = scmp.lt.s32.totalorder %s2737_s18, %s2730_s24 }
  0x98   : > { %p2733_p2 = pnand %p2731_p0, %p3489_p7 }
  0x99   : > { %p2740_p9 = por %p2739_p8, %p2738_p6 }
  0x9a   : > { %p2734_p4 = pneg %p2733_p2 }
  0x9c   : > { %p2741_p10 = pnand %p2740_p9, %p2734_p4 }
  0x9e   : > { %2744 = shalt.err (!%p2741_p10)
}
  0x9f   : > { %2410 = dma.hbm_to_vmem [thread:$0]  (!%p3473_p5), %s4288_s7, 16, %s543_s21, [#allocation17]  }
  0xa0   : > { %s4289_s9 = sld [smem:[#allocation66_spill]] }
  0xa6   : > { %s2745_s25 = scalar_lea.hbm %s4289_s9, 16 }
  0xa7   : > { %p2746_p1 = scmp.ne.s32.totalorder %s4289_s9, %s2745_s25  ;;  %p2752_p12 = scmp.lt.u32.totalorder %s2745_s25, %s4289_s9 }
  0xa9   : > { %p2748_p3 = pnand %p2746_p1, %p3489_p7 }
  0xab   : > { %p2749_p11 = pneg %p2748_p3 }
  0xad   : > { %p2754_p13 = pnand %p2752_p12, %p2749_p11 }
  0xaf   : > { %2757 = shalt.err (!%p2754_p13)
}
  0xb0   : > { %s2758_s24 = scalar_lea.vmem %s567_s17, 16  ;;  %s2765_s21 = scalar_lea.vmem %s567_s17, 32 }
  0xb1   : > { %p2759_p0 = scmp.ne.s32.totalorder %s567_s17, %s2758_s24  ;;  %p2766_p6 = scmp.lt.s32.totalorder %s567_s17, %s567_s17 }
  0xb2   : > { %p2767_p8 = scmp.lt.s32.totalorder %s2765_s21, %s2758_s24 }
  0xb3   : > { %p2761_p2 = pnand %p2759_p0, %p3489_p7 }
  0xb4   : > { %p2768_p9 = por %p2767_p8, %p2766_p6 }
  0xb5   : > { %p2762_p4 = pneg %p2761_p2 }
  0xb7   : > { %p2769_p10 = pnand %p2768_p9, %p2762_p4 }
  0xb9   : > { %2772 = shalt.err (!%p2769_p10)
}
  0xba   : > { %2416 = dma.hbm_to_vmem [thread:$0]  (!%p3473_p5), %s4289_s9, 16, %s567_s17, [#allocation20]  }
  0xbb   : > { %s3284_s22 = smov [#allocation22]   ;;  %s3285_s0 = smov [#allocation25]  }
  0xbc   : > { %s590_s26 = sshll.u32 %s3284_s22, 4  ;;  %s614_s25 = sshll.u32 %s3285_s0, 4  ;;  %s591_s26 = int_to_ptr.vmem [resolvable:$true] %s590_s26  ;;  %s615_s25 = int_to_ptr.vmem [resolvable:$true] %s614_s25 }
  0xbd   : > { %s4290_s11 = sld [smem:[#allocation68_spill]] }
  0xc3   : > { %s2773_s30 = scalar_lea.hbm %s4290_s11, 16 }
  0xc4   : > { %p2774_p1 = scmp.ne.s32.totalorder %s4290_s11, %s2773_s30  ;;  %p2780_p12 = scmp.lt.u32.totalorder %s2773_s30, %s4290_s11 }
  0xc6   : > { %p2776_p3 = pnand %p2774_p1, %p3489_p7 }
  0xc8   : > { %p2777_p11 = pneg %p2776_p3 }
  0xca   : > { %p2782_p13 = pnand %p2780_p12, %p2777_p11 }
  0xcc   : > { %2785 = shalt.err (!%p2782_p13)
}
  0xcd   : > { %s2786_s17 = scalar_lea.vmem %s591_s26, 16  ;;  %s2793_s19 = scalar_lea.vmem %s591_s26, 32 }
  0xce   : > { %p2787_p0 = scmp.ne.s32.totalorder %s591_s26, %s2786_s17  ;;  %p2794_p6 = scmp.lt.s32.totalorder %s591_s26, %s591_s26 }
  0xcf   : > { %p2795_p8 = scmp.lt.s32.totalorder %s2793_s19, %s2786_s17 }
  0xd0   : > { %p2789_p2 = pnand %p2787_p0, %p3489_p7 }
  0xd1   : > { %p2796_p9 = por %p2795_p8, %p2794_p6 }
  0xd2   : > { %p2790_p4 = pneg %p2789_p2 }
  0xd4   : > { %p2797_p10 = pnand %p2796_p9, %p2790_p4 }
  0xd6   : > { %2800 = shalt.err (!%p2797_p10)
}
  0xd7   : > { %2422 = dma.hbm_to_vmem [thread:$0]  (!%p3473_p5), %s4290_s11, 16, %s591_s26, [#allocation23]  }
  0xd8   : > { %s4291_s13 = sld [smem:[#allocation70_spill]] }
  0xde   : > { %s2801_s30 = scalar_lea.hbm %s4291_s13, 16 }
  0xdf   : > { %p2802_p1 = scmp.ne.s32.totalorder %s4291_s13, %s2801_s30  ;;  %p2808_p12 = scmp.lt.u32.totalorder %s2801_s30, %s4291_s13 }
  0xe1   : > { %p2804_p3 = pnand %p2802_p1, %p3489_p7 }
  0xe3   : > { %p2805_p11 = pneg %p2804_p3 }
  0xe5   : > { %p2810_p13 = pnand %p2808_p12, %p2805_p11 }
  0xe7   : > { %2813 = shalt.err (!%p2810_p13)
}
  0xe8   : > { %s2814_s17 = scalar_lea.vmem %s615_s25, 16  ;;  %s2821_s26 = scalar_lea.vmem %s615_s25, 32 }
  0xe9   : > { %p2815_p0 = scmp.ne.s32.totalorder %s615_s25, %s2814_s17  ;;  %p2822_p6 = scmp.lt.s32.totalorder %s615_s25, %s615_s25 }
  0xea   : > { %p2823_p8 = scmp.lt.s32.totalorder %s2821_s26, %s2814_s17 }
  0xeb   : > { %p2817_p2 = pnand %p2815_p0, %p3489_p7 }
  0xec   : > { %p2824_p9 = por %p2823_p8, %p2822_p6 }
  0xed   : > { %p2818_p4 = pneg %p2817_p2 }
  0xef   : > { %p2825_p10 = pnand %p2824_p9, %p2818_p4 }
  0xf1   : > { %2828 = shalt.err (!%p2825_p10)
}
  0xf2   : > { %2428 = dma.hbm_to_vmem [thread:$0]  (!%p3473_p5), %s4291_s13, 16, %s615_s25, [#allocation26]  }
  0xf3   : > { %s3286_s0 = smov [#allocation12]   ;;  %s3287_s28 = smov [#allocation15]  }
  0xf4   : > { %s504_s23 = sshll.u32 %s3286_s0, 4  ;;  %s528_s30 = sshll.u32 %s3287_s28, 4  ;;  %s505_s23 = int_to_ptr.vmem [resolvable:$true] %s504_s23  ;;  %s529_s30 = int_to_ptr.vmem [resolvable:$true] %s528_s30 }
  0xf5   : > { %s4292_s4 = sld [smem:[#allocation61_spill]] }
  0xfb   : > { %s2829_s21 = scalar_lea.hbm %s4292_s4, 256 }
  0xfc   : > { %p2830_p1 = scmp.ne.s32.totalorder %s4292_s4, %s2829_s21  ;;  %p2836_p12 = scmp.lt.u32.totalorder %s2829_s21, %s4292_s4 }
  0xfe   : > { %p2832_p3 = pnand %p2830_p1, %p3489_p7 }
 0x100   : > { %p2833_p11 = pneg %p2832_p3 }
 0x102   : > { %p2838_p13 = pnand %p2836_p12, %p2833_p11 }
 0x104   : > { %2841 = shalt.err (!%p2838_p13)
}
 0x105   : > { %s2842_s25 = scalar_lea.vmem %s505_s23, 256  ;;  %p2850_p6 = scmp.lt.s32.totalorder %s505_s23, %s505_s23 }
 0x106   : > { %p2843_p0 = scmp.ne.s32.totalorder %s505_s23, %s2842_s25  ;;  %p2851_p8 = scmp.lt.s32.totalorder %s2842_s25, %s2842_s25 }
 0x108   : > { %p2845_p2 = pnand %p2843_p0, %p3489_p7  ;;  %p2852_p9 = por %p2851_p8, %p2850_p6 }
 0x10a   : > { %p2846_p4 = pneg %p2845_p2 }
 0x10c   : > { %p2853_p10 = pnand %p2852_p9, %p2846_p4 }
 0x10e   : > { %2856 = shalt.err (!%p2853_p10)
}
 0x10f   : > { %s4293_s22 = smov 64   ;;  %s4294_s6 = sld [smem:[#allocation63_spill]] }
 0x110   : > { %2401 = dma.hbm_to_vmem [thread:$0]  (!%p3473_p5), %s4292_s4, 256, %s505_s23, [#allocation11], %s4293_s22, %s4293_s22, %s4250_s27  }
 0x115   : > { %s2857_s21 = scalar_lea.hbm %s4294_s6, 256 }
 0x116   : > { %p2858_p1 = scmp.ne.s32.totalorder %s4294_s6, %s2857_s21  ;;  %p2864_p12 = scmp.lt.u32.totalorder %s2857_s21, %s4294_s6 }
 0x118   : > { %p2860_p3 = pnand %p2858_p1, %p3489_p7 }
 0x11a   : > { %p2861_p11 = pneg %p2860_p3 }
 0x11c   : > { %p2866_p13 = pnand %p2864_p12, %p2861_p11 }
 0x11e   : > { %2869 = shalt.err (!%p2866_p13)
}
 0x11f   : > { %s2870_s25 = scalar_lea.vmem %s529_s30, 256  ;;  %p2878_p6 = scmp.lt.s32.totalorder %s529_s30, %s529_s30 }
 0x120   : > { %p2871_p0 = scmp.ne.s32.totalorder %s529_s30, %s2870_s25  ;;  %p2879_p8 = scmp.lt.s32.totalorder %s2870_s25, %s2870_s25 }
 0x122   : > { %p2873_p2 = pnand %p2871_p0, %p3489_p7  ;;  %p2880_p9 = por %p2879_p8, %p2878_p6 }
 0x124   : > { %p2874_p4 = pneg %p2873_p2 }
 0x126   : > { %p2881_p10 = pnand %p2880_p9, %p2874_p4 }
 0x128   : > { %2884 = shalt.err (!%p2881_p10)
}
 0x129   : > { %2407 = dma.hbm_to_vmem [thread:$0]  (!%p3473_p5), %s4294_s6, 256, %s529_s30, [#allocation14], %s4293_s22, %s4293_s22, %s4250_s27  }
 0x12a   : > { %s3288_s28 = smov [#allocation18]   ;;  %s3289_s24 = smov [#allocation21]  }
 0x12b   : > { %s552_s29 = sshll.u32 %s3288_s28, 4  ;;  %s576_s21 = sshll.u32 %s3289_s24, 4  ;;  %s553_s29 = int_to_ptr.vmem [resolvable:$true] %s552_s29  ;;  %s577_s21 = int_to_ptr.vmem [resolvable:$true] %s576_s21 }
 0x12c   : > { %s4295_s8 = sld [smem:[#allocation65_spill]] }
 0x132   : > { %s2885_s26 = scalar_lea.hbm %s4295_s8, 256 }
 0x133   : > { %p2886_p1 = scmp.ne.s32.totalorder %s4295_s8, %s2885_s26  ;;  %p2892_p12 = scmp.lt.u32.totalorder %s2885_s26, %s4295_s8 }
 0x135   : > { %p2888_p3 = pnand %p2886_p1, %p3489_p7 }
 0x137   : > { %p2889_p11 = pneg %p2888_p3 }
 0x139   : > { %p2894_p13 = pnand %p2892_p12, %p2889_p11 }
 0x13b   : > { %2897 = shalt.err (!%p2894_p13)
}
 0x13c   : > { %s2898_s30 = scalar_lea.vmem %s553_s29, 256  ;;  %p2906_p6 = scmp.lt.s32.totalorder %s553_s29, %s553_s29 }
 0x13d   : > { %p2899_p0 = scmp.ne.s32.totalorder %s553_s29, %s2898_s30  ;;  %p2907_p8 = scmp.lt.s32.totalorder %s2898_s30, %s2898_s30 }
 0x13f   : > { %p2901_p2 = pnand %p2899_p0, %p3489_p7  ;;  %p2908_p9 = por %p2907_p8, %p2906_p6 }
 0x141   : > { %p2902_p4 = pneg %p2901_p2 }
 0x143   : > { %p2909_p10 = pnand %p2908_p9, %p2902_p4 }
 0x145   : > { %2912 = shalt.err (!%p2909_p10)
}
 0x146   : > { %2413 = dma.hbm_to_vmem [thread:$0]  (!%p3473_p5), %s4295_s8, 256, %s553_s29, [#allocation17], %s4293_s22, %s4293_s22, %s4250_s27  }
 0x147   : > { %s4296_s10 = sld [smem:[#allocation67_spill]] }
 0x14d   : > { %s2913_s18 = scalar_lea.hbm %s4296_s10, 256 }
 0x14e   : > { %p2914_p1 = scmp.ne.s32.totalorder %s4296_s10, %s2913_s18  ;;  %p2920_p12 = scmp.lt.u32.totalorder %s2913_s18, %s4296_s10 }
 0x150   : > { %p2916_p3 = pnand %p2914_p1, %p3489_p7 }
 0x152   : > { %p2917_p11 = pneg %p2916_p3 }
 0x154   : > { %p2922_p13 = pnand %p2920_p12, %p2917_p11 }
 0x156   : > { %2925 = shalt.err (!%p2922_p13)
}
 0x157   : > { %s2926_s23 = scalar_lea.vmem %s577_s21, 256  ;;  %p2934_p6 = scmp.lt.s32.totalorder %s577_s21, %s577_s21 }
 0x158   : > { %p2927_p0 = scmp.ne.s32.totalorder %s577_s21, %s2926_s23  ;;  %p2935_p8 = scmp.lt.s32.totalorder %s2926_s23, %s2926_s23 }
 0x15a   : > { %p2929_p2 = pnand %p2927_p0, %p3489_p7  ;;  %p2936_p9 = por %p2935_p8, %p2934_p6 }
 0x15c   : > { %p2930_p4 = pneg %p2929_p2 }
 0x15e   : > { %p2937_p10 = pnand %p2936_p9, %p2930_p4 }
 0x160   : > { %2940 = shalt.err (!%p2937_p10)
}
 0x161   : > { %2419 = dma.hbm_to_vmem [thread:$0]  (!%p3473_p5), %s4296_s10, 256, %s577_s21, [#allocation20], %s4293_s22, %s4293_s22, %s4250_s27  }
 0x162   : > { %s3290_s2 = smov [#allocation24]   ;;  %s3291_s28 = smov [#allocation27]  }
 0x163   : > { %s600_s0 = sshll.u32 %s3290_s2, 4  ;;  %s625_s24 = sshll.u32 %s3291_s28, 4  ;;  %s601_s0 = int_to_ptr.vmem [resolvable:$true] %s600_s0  ;;  %s626_s24 = int_to_ptr.vmem [resolvable:$true] %s625_s24 }
 0x164   : > { %s4297_s12 = sld [smem:[#allocation69_spill]] }
 0x16a   : > { %s2941_s26 = scalar_lea.hbm %s4297_s12, 512 }
 0x16b   : > { %p2942_p1 = scmp.ne.s32.totalorder %s4297_s12, %s2941_s26  ;;  %p2948_p12 = scmp.lt.u32.totalorder %s2941_s26, %s4297_s12 }
 0x16d   : > { %p2944_p3 = pnand %p2942_p1, %p3489_p7 }
 0x16f   : > { %p2945_p11 = pneg %p2944_p3 }
 0x171   : > { %p2950_p13 = pnand %p2948_p12, %p2945_p11 }
 0x173   : > { %2953 = shalt.err (!%p2950_p13)
}
 0x174   : > { %s2954_s21 = scalar_lea.vmem %s601_s0, 512  ;;  %p2962_p6 = scmp.lt.s32.totalorder %s601_s0, %s601_s0 }
 0x175   : > { %p2955_p0 = scmp.ne.s32.totalorder %s601_s0, %s2954_s21  ;;  %p2963_p8 = scmp.lt.s32.totalorder %s2954_s21, %s2954_s21 }
 0x177   : > { %p2957_p2 = pnand %p2955_p0, %p3489_p7  ;;  %p2964_p9 = por %p2963_p8, %p2962_p6 }
 0x179   : > { %p2958_p4 = pneg %p2957_p2 }
 0x17b   : > { %p2965_p10 = pnand %p2964_p9, %p2958_p4 }
 0x17d   : > { %2968 = shalt.err (!%p2965_p10)
}
 0x17e   : > { %2425 = dma.hbm_to_vmem [thread:$0]  (!%p3473_p5), %s4297_s12, 512, %s601_s0, [#allocation23], %s4293_s22, %s4293_s22, %s4250_s27  }
 0x17f   : > { %s2969_s17 = scalar_lea.hbm %s4225_s14, 16 }
 0x180   : > { %p2970_p1 = scmp.ne.s32.totalorder %s4225_s14, %s2969_s17  ;;  %p2976_p12 = scmp.lt.u32.totalorder %s2969_s17, %s4225_s14 }
 0x182   : > { %p2972_p3 = pnand %p2970_p1, %p3489_p7 }
 0x184   : > { %p2973_p11 = pneg %p2972_p3 }
 0x186   : > { %p2978_p13 = pnand %p2976_p12, %p2973_p11 }
 0x188   : > { %2981 = shalt.err (!%p2978_p13)
}
 0x189   : > { %s2982_s29 = scalar_lea.vmem %s626_s24, 16  ;;  %s2989_s0 = scalar_lea.vmem %s626_s24, 32 }
 0x18a   : > { %p2983_p0 = scmp.ne.s32.totalorder %s626_s24, %s2982_s29  ;;  %p2990_p6 = scmp.lt.s32.totalorder %s626_s24, %s626_s24 }
 0x18b   : > { %p2991_p8 = scmp.lt.s32.totalorder %s2989_s0, %s2982_s29 }
 0x18c   : > { %p2985_p2 = pnand %p2983_p0, %p3489_p7 }
 0x18d   : > { %p2992_p9 = por %p2991_p8, %p2990_p6 }
 0x18e   : > { %p2986_p4 = pneg %p2985_p2 }
 0x190   : > { %p2993_p10 = pnand %p2992_p9, %p2986_p4 }
 0x192   : > { %2996 = shalt.err (!%p2993_p10)
}
 0x193   : > { %2431 = dma.hbm_to_vmem [thread:$0]  (!%p3473_p5), %s4225_s14, 16, %s626_s24, [#allocation26]  }
 0x194   : > { %s3292_s2 = smov [#allocation28]   ;;  %s2997_s26 = scalar_lea.hbm %s4226_s15, 16 }
 0x195   : > { %s636_s28 = sshll.u32 %s3292_s2, 4  ;;  %p2998_p1 = scmp.ne.s32.totalorder %s4226_s15, %s2997_s26  ;;  %s637_s28 = int_to_ptr.vmem [resolvable:$true] %s636_s28 }
 0x196   : > { %p3004_p12 = scmp.lt.u32.totalorder %s2997_s26, %s4226_s15 }
 0x197   : > { %p3000_p3 = pnand %p2998_p1, %p3489_p7 }
 0x199   : > { %p3001_p11 = pneg %p3000_p3 }
 0x19b   : > { %p3006_p13 = pnand %p3004_p12, %p3001_p11 }
 0x19d   : > { %3009 = shalt.err (!%p3006_p13)
}
 0x19e   : > { %s3010_s24 = scalar_lea.vmem %s637_s28, 16  ;;  %s3017_s0 = scalar_lea.vmem %s637_s28, 32 }
 0x19f   : > { %p3011_p0 = scmp.ne.s32.totalorder %s637_s28, %s3010_s24  ;;  %p3018_p6 = scmp.lt.s32.totalorder %s637_s28, %s637_s28 }
 0x1a0   : > { %p3019_p8 = scmp.lt.s32.totalorder %s3017_s0, %s3010_s24 }
 0x1a1   : > { %p3013_p2 = pnand %p3011_p0, %p3489_p7 }
 0x1a2   : > { %p3020_p9 = por %p3019_p8, %p3018_p6 }
 0x1a3   : > { %p3014_p4 = pneg %p3013_p2 }
 0x1a5   : > { %p3021_p10 = pnand %p3020_p9, %p3014_p4 }
 0x1a7   : > { %3024 = shalt.err (!%p3021_p10)
}
 0x1a8   : > { %s4298_s2 = sld [smem:[#allocation53_spill]]  ;;  %s4299_s18 = sld [smem:[#allocation54_spill]] }
 0x1a9   : > { %s4300_s17 = sld [smem:[#allocation50_spill]]  ;;  %s4301_s26 = sld [smem:[#allocation49_spill]] }
 0x1aa   : > { %s4302_s20 = sld [smem:[#allocation48_spill]]  ;;  %s4303_s19 = sld [smem:[#allocation47_spill]] }
 0x1ab   : > { %2434 = dma.hbm_to_vmem [thread:$0]  (!%p3473_p5), %s4226_s15, 16, %s637_s28, [#allocation29]  }
 0x1ac   : > { %s4304_s16 = sld [smem:[#allocation55_spill]]  ;;  %s2103_s25 = sadd.s32 4294967294, %s3275_s1  }
 0x1ad   : > { %s4305_s23 = sld [smem:[#allocation46_spill]]  ;;  %s4306_s24 = sld [smem:[#allocation45_spill]] }
 0x1ae   : > { %s56_s29 = sadd.s32 1, %s4298_s2  ;;  %s59_s0 = sadd.s32 1, %s4299_s18 }
 0x1af   : > { %p57_p7 = scmp.ge.s32.totalorder %s56_s29, 2  ;;  %s68_s21 = sadd.s32 1, %s4300_s17 }
 0x1b0   : > { %p75_p1 = scmp.ne.s32.totalorder %s4300_s17, %s4301_s26  ;;  %p76_p5 = scmp.eq.s32.totalorder %s3275_s1, 0 }
 0x1b1   : > { %s4366_s29 = smov (%p57_p7, %s56_s29), 0  ;;  %s4368_s0 = smov (!%p57_p7, %s59_s0), %s4299_s18 }
 0x1b2   : > { %s64_s28 = ssub.s32 %s4298_s2, %s4366_s29  ;;  %p61_p3 = scmp.ge.s32.totalorder %s4368_s0, 2 }
 0x1b3   : > { %p81_p11 = scmp.ne.s32.totalorder %s4301_s26, %s4302_s20  ;;  %p3788_p12 = por %p76_p5, %p75_p1 }
 0x1b4   : > { %s94_s27 = sadd.s32 1, %s4303_s19  ;;  %s4370_s0 = smov (%p61_p3, %s4368_s0), 0 }
 0x1b5   : > { %p4308_p13 = scmp.eq.s32.totalorder %s4304_s16, 0  ;;  %p101_p2 = scmp.ne.s32.totalorder %s4303_s19, %s4305_s23 }
 0x1b6   : > { %s63_s4 = ssub.s32 %s4299_s18, %s4370_s0  ;;  %p107_p4 = scmp.ne.s32.totalorder %s4305_s23, %s4306_s24 }
 0x1b7   : > { %p3800_p0 = por %p4308_p13, %p81_p11  ;;  %s65_s5 = sor.u32 %s64_s28, %s63_s4 }
 0x1b8   : > { %p92_p6 = scmp.eq.s32.totalorder %s63_s4, 0  ;;  %p66_p8 = scmp.eq.s32.totalorder %s65_s5, 0 }
 0x1b9   : > { %s4309_s3 = scalar_select %p3800_p0, 1, 0 }
 0x1ba   : > { %p3812_p9 = por %p101_p2, %p76_p5  ;;  %p4311_p10 = pmov %p4308_p13 }
 0x1bb   : > { %s3817_s7 = scalar_select %p92_p6, %s4303_s19, %s94_s27  }
 0x1bc   : > { %s3820_s8 = scalar_select %p66_p8, %s4300_s17, %s68_s21  }
 0x1bd   : > { %p3824_p7 = por %p107_p4, %p4311_p10  ;;  %p427_p3 = scmp.eq.s32.totalorder %s4304_s16, 3 }
 0x1be   : > { %p433_p13 = scmp.eq.s32.totalorder %s2103_s25, 3  ;;  %p2463_p5 = scmp.lt.s32.totalorder %s3275_s1, 4 }
 0x1bf   : > { %s4312_s9 = scalar_select %p3824_p7, 1, 0 }
 0x1c0   : > { %p3833_p2 = por %p427_p3, %p75_p1  ;;  %s647_s5 = sand.u32 1, %s4300_s17  }
 0x1c1   : > { %p3841_p6 = por %p433_p13, %p81_p11  ;;  %s2120_s23 = sshll.u32 %s647_s5, 3 }
 0x1c2   : > { %s4313_s4 = scalar_select %p3833_p2, 1, 0 }
 0x1c3   : > { %s4314_s27 = scalar_select %p3841_p6, 1, 0 }
 0x1c4   : > { %s2121_s24 = sshll.u32 %s4299_s18, 1  ;;  %s651_s16 = scalar_lea.vmem [#allocation4], %s2120_s23 }
 0x1c5   : > { %s656_s21 = sadd.s32 %s4298_s2, %s2121_s24  ;;  %s660_s10 = sshll.u32 %s651_s16, 4  ;;  %s3852_s10 = int_to_ptr.vmem [resolvable:$true] %s660_s10 }
 0x1c6   : > { %s2122_s28 = sshll.u32 %s656_s21, 7  ;;  %s4315_s12 = sld [smem:[#allocation57_spill]] }
 0x1c7   : > { %p3858_p1 = pnand %p2463_p5, %p3788_p12  ;;  %p3866_p11 = pnand %p2463_p5, %p3812_p9 }
 0x1c8   : > { %s667_s2 = sand.u32 1, %s3275_s1   ;;  %s669_s26 = sand.u32 1, %s4303_s19  }
 0x1c9   : > { %s648_s20 = scalar_lea.sflag [#allocation5], %s647_s5  ;;  %p3027_p8 = pneg %p3858_p1 }
 0x1cc   : > { %s3850_s13 = scalar_lea.hbm %s4315_s12, %s2122_s28  ;;  %s3030_s24 = scalar_lea.hbm %s4315_s12, 512 }
 0x1cd   : > { %s3025_s23 = scalar_lea.hbm %s3850_s13, 128  ;;  %p3031_p9 = scmp.lt.u32.totalorder %s3850_s13, %s4315_s12 }
 0x1ce   : > { %p3026_p4 = scmp.ne.s32.totalorder %s3850_s13, %s3025_s23  ;;  %p3032_p3 = scmp.lt.u32.totalorder %s3030_s24, %s3025_s23 }
 0x1cf   : > { %p3034_p5 = scmp.lt.u32.totalorder %s3025_s23, %s3850_s13 }
 0x1d0   : > { %p3028_p12 = pnand %p3027_p8, %p3026_p4  ;;  %p3033_p13 = por %p3032_p3, %p3031_p9 }
 0x1d2   : > { %p3029_p10 = pneg %p3028_p12  ;;  %p3035_p6 = por %p3034_p5, %p3033_p13 }
 0x1d4   : > { %p3036_p2 = pnand %p3035_p6, %p3029_p10 }
 0x1d6   : > { %3039 = shalt.err (!%p3036_p2)
}
 0x1d7   : > { %s3040_s5 = scalar_lea.vmem %s3852_s10, 128  ;;  %s3293_s16 = smov [#allocation4]  }
 0x1d8   : > { %p3041_p4 = scmp.ne.s32.totalorder %s3852_s10, %s3040_s5  ;;  %s3045_s25 = sshll.u32 %s3293_s16, 4  ;;  %s3046_s25 = int_to_ptr.vmem [resolvable:$false] %s3045_s25 }
 0x1d9   : > { %s3047_s30 = scalar_lea.vmem %s3046_s25, 256  ;;  %p3048_p0 = scmp.lt.s32.totalorder %s3852_s10, %s3046_s25 }
 0x1da   : > { %p3043_p12 = pnand %p3041_p4, %p3027_p8  ;;  %p3049_p9 = scmp.lt.s32.totalorder %s3047_s30, %s3040_s5 }
 0x1dc   : > { %p3044_p7 = pneg %p3043_p12  ;;  %p3050_p3 = por %p3049_p9, %p3048_p0 }
 0x1de   : > { %p3051_p13 = pnand %p3050_p3, %p3044_p7 }
 0x1e0   : > { %3054 = shalt.err (!%p3051_p13)
}
 0x1e1   : > { %2438 = dma.hbm_to_vmem [thread:$0]  (!%p3858_p1), %s3850_s13, 128, %s3852_s10, %s648_s20  }
 0x1e2   : > { %s2123_s23 = sshll.u32 %s669_s26, 3  ;;  %s2191_s6 = sshll.u32 %s4299_s18, 7 }
 0x1e3   : > { %s4318_s28 = sld [smem:[#allocation58_spill]]  ;;  %s671_s17 = scalar_lea.vmem [#allocation7], %s2123_s23 }
 0x1e4   : > { %s678_s25 = sshll.u32 %s671_s17, 4  ;;  %s3909_s30 = scalar_lea.sflag [#allocation8], %s667_s2  ;;  %s3905_s25 = int_to_ptr.vmem [resolvable:$true] %s678_s25 }
 0x1e5   : > { %p3057_p7 = pneg %p3866_p11 }
 0x1e9   : > { %s4319_s16 = smov %s4318_s28  ;;  %s3903_s5 = scalar_lea.hbm %s4318_s28, %s2191_s6 }
 0x1ea   : > { %s3055_s10 = scalar_lea.hbm %s3903_s5, 128  ;;  %s3060_s19 = scalar_lea.hbm %s4319_s16, 256 }
 0x1eb   : > { %p3056_p0 = scmp.ne.s32.totalorder %s3903_s5, %s3055_s10  ;;  %p3061_p1 = scmp.lt.u32.totalorder %s3903_s5, %s4319_s16 }
 0x1ec   : > { %p3062_p8 = scmp.lt.u32.totalorder %s3060_s19, %s3055_s10  ;;  %p3064_p5 = scmp.lt.u32.totalorder %s3055_s10, %s3903_s5 }
 0x1ed   : > { %p3058_p2 = pnand %p3057_p7, %p3056_p0 }
 0x1ee   : > { %p3063_p10 = por %p3062_p8, %p3061_p1 }
 0x1ef   : > { %p3059_p6 = pneg %p3058_p2 }
 0x1f0   : > { %p3065_p4 = por %p3064_p5, %p3063_p10 }
 0x1f2   : > { %p3066_p12 = pnand %p3065_p4, %p3059_p6 }
 0x1f4   : > { %3069 = shalt.err (!%p3066_p12)
}
 0x1f5   : > { %s3070_s2 = scalar_lea.vmem %s3905_s25, 128  ;;  %s3294_s23 = smov [#allocation7]  }
 0x1f6   : > { %p3071_p9 = scmp.ne.s32.totalorder %s3905_s25, %s3070_s2  ;;  %s3075_s6 = sshll.u32 %s3294_s23, 4  ;;  %s3076_s6 = int_to_ptr.vmem [resolvable:$false] %s3075_s6 }
 0x1f7   : > { %s3077_s24 = scalar_lea.vmem %s3076_s6, 256  ;;  %p3078_p0 = scmp.lt.s32.totalorder %s3905_s25, %s3076_s6 }
 0x1f8   : > { %p3073_p3 = pnand %p3071_p9, %p3057_p7  ;;  %p3079_p2 = scmp.lt.s32.totalorder %s3077_s24, %s3070_s2 }
 0x1fa   : > { %p3074_p13 = pneg %p3073_p3  ;;  %p3080_p1 = por %p3079_p2, %p3078_p0 }
 0x1fc   : > { %p3081_p8 = pnand %p3080_p1, %p3074_p13 }
 0x1fe   : > { %3084 = shalt.err (!%p3081_p8)
}
 0x1ff   : > { %s4320_s21 = smov 4   ;;  %s4321_s28 = sld [smem:[#allocation56_spill]] }
 0x200   : > { %2441 = dma.hbm_to_vmem [thread:$0]  (!%p3866_p11), %s3903_s5, 128, %s3905_s25, %s3909_s30, %s4293_s22, %s4293_s22, %s4320_s21  }
 0x205   : > { %p4322_p7 = scmp.ne.s32.totalorder %s4321_s28, 0 }
 0x206   : > { %s4323_s17 = sld [smem:[#allocation49_spill]] (!%p4322_p7)  ;;  %p4324_p6 = scmp.ne.s32.totalorder (!%p4322_p7), %s4309_s3, 0 }
 0x207   : > { %690 = sbr.rel (%p4322_p7) target bundleno = 3423 (0xd5f), region = 84 }
 0x20c   : > { %s3943_s10 = sand.u32 (!%p4322_p7), 1, %s4323_s17  }
 0x20d   : > { %s2127_s13 = sshll.u32 (!%p4322_p7), %s3943_s10, 3  ;;  %s693_s18 = scalar_lea.sflag (!%p4322_p7), [#allocation5], %s3943_s10 }
 0x20e   : > { %s696_s11 = scalar_lea.vmem [#allocation4], %s2127_s13 }
 0x20f   : > { %3186 = dma.done.wait (%p4324_p6), %s693_s18, 128  }
 0x210   : > { %3188 = vsyncadd (%p4324_p6), %s693_s18, 4294967168  ;;  %s4325_s22 = sld [smem:[#allocation55_spill]]  ;;  %s4326_s5 = sld [smem:[#allocation46_spill]] }
 0x211   : > { %p4327_p11 = scmp.ne.s32.totalorder %s4312_s9, 0 }
 0x216   : > { %s701_s25 = sand.u32 1, %s4325_s22   ;;  %s703_s30 = sand.u32 1, %s4326_s5  }
 0x217   : > { %s3955_s19 = sshll.u32 %s703_s30, 3  ;;  %s702_s26 = scalar_lea.sflag [#allocation8], %s701_s25 }
 0x218   : > { %s705_s20 = scalar_lea.vmem [#allocation7], %s3955_s19 }
 0x219   : > { %3190 = dma.done.wait (%p4327_p11), %s702_s26, 128  }
 0x21a   : > { %3192 = vsyncadd (%p4327_p11), %s702_s26, 4294967168  ;;  %p4328_p10 = scmp.eq.s32.totalorder %s4325_s22, 0 }
 0x21c   : > { %3194 = dma.done.wait (%p4328_p10), [#allocation8], 256   ;;  %p4329_p5 = pmov %p4328_p10 }
 0x21e   : > { %3196 = vsyncadd (%p4329_p5), [#allocation8], 4294967040  ;;  %p4330_p4 = pmov %p4329_p5 }
 0x220   : > { %3198 = dma.done.wait (%p4330_p4), [#allocation11], 272   ;;  %p4331_p12 = pmov %p4330_p4 }
 0x221   : > { %p4332_p9 = pmov %p4330_p4 }
 0x222   : > { %3200 = vsyncadd (%p4331_p12), [#allocation11], 4294967024 }
 0x223   : > { %3202 = dma.done.wait (%p4332_p9), [#allocation14], 272   ;;  %p4333_p3 = pmov %p4330_p4 }
 0x225   : > { %3204 = vsyncadd (%p4333_p3), [#allocation14], 4294967024  ;;  %p4334_p13 = pmov %p4333_p3 }
 0x226   : > { %p4335_p0 = pmov %p4333_p3 }
 0x227   : > { %3206 = dma.done.wait (%p4334_p13), [#allocation17], 272  }
 0x228   : > { %3208 = vsyncadd (%p4335_p0), [#allocation17], 4294967024  ;;  %p4336_p2 = pmov %p4335_p0 }
 0x229   : > { %p4337_p1 = pmov %p4335_p0 }
 0x22a   : > { %3210 = dma.done.wait (%p4336_p2), [#allocation20], 272  }
 0x22b   : > { %3212 = vsyncadd (%p4337_p1), [#allocation20], 4294967024  ;;  %p4338_p8 = pmov %p4335_p0 }
 0x22c   : > { %p4339_p7 = pmov %p4335_p0 }
 0x22d   : > { %3214 = dma.done.wait (%p4338_p8), [#allocation23], 528  }
 0x22e   : > { %3216 = vsyncadd (%p4339_p7), [#allocation23], 4294966768  ;;  %p4340_p6 = pmov %p4335_p0 }
 0x22f   : > { %p4341_p11 = pmov %p4335_p0 }
 0x230   : > { %3218 = dma.done.wait (%p4340_p6), [#allocation26], 32  }
 0x231   : > { %3220 = vsyncadd (%p4341_p11), [#allocation26], 4294967264  ;;  %p4342_p10 = pmov %p4335_p0 }
 0x232   : > { %p4343_p5 = pmov %p4335_p0 }
 0x233   : > { %3222 = dma.done.wait (%p4342_p10), [#allocation29], 16  }
 0x234   : > { %3224 = vsyncadd (%p4343_p5), [#allocation29], 4294967280  ;;  %s2144_s3 = sshll.u32 %s3943_s10, 5  ;;  %v3995_v0 = vld [vmem:[%s696_s11] sm:$0xff]  ;;  %s3999_s9 = scalar_lea.vmem [#allocation30], %s2127_s13 }
 0x235   : > { %s4001_s2 = scalar_lea.vmem [#allocation31], %s2144_s3  ;;  %s4344_s23 = sld [smem:[#allocation51_spill]] }
 0x23b   : > { %p2145_p4 = scmp.ne.s32.totalorder %s4344_s23, 0 }
 0x23c   : > { %v2598_v1 = vld [vmem:[#allocation12] sm:$0xff] (!%p2145_p4)   ;;  %v3295_v2 = vmov (!%p2145_p4), 0.0   ;;  %v2599_v3 = vld [vmem:[#allocation15] sm:$0xff] (!%p2145_p4)   ;;  %v2600_v4 = vld [vmem:[#allocation12 + $0x8] sm:$0xff] (!%p2145_p4)   ;;  %vm3296_vm0 = vmmov (!%p2145_p4), 0   ;;  %vm858_vm1 = vcmask (!%p2145_p4), 261120  }
 0x23d   : > { %827 = sbr.rel (%p2145_p4) target bundleno = 923 (0x39b), region = 152  ;;  %2228 = vmatprep.subr.bf16.mxu0 (!%p2145_p4), %v3295_v2  ;;  %2236 = vmatprep.subr.bf16.mxu1 (!%p2145_p4), %v3295_v2  ;;  %v2601_v5 = vld [vmem:[#allocation15 + $0x8] sm:$0xff] (!%p2145_p4)   ;;  %v2151_v7 = vld [vmem:[#allocation16] ss:$0 sm:$0xff] (!%p2145_p4)  ;;  %v2146_v8 = vld [vmem:[#allocation13] ss:$0 sm:$0xff] (!%p2145_p4) }
 0x23e   : > { %2229 = vmatpush3.bf16.msra.mxu0 (!%p2145_p4), %v2598_v1  ;;  %2232 = vmatprep.mubr.msk.bf16.mxu0 (!%p2145_p4), %vm3296_vm0, %v3295_v2  ;;  %v2602_v6 = vld [vmem:[%s705_s20] sm:$0xff] (!%p2145_p4)   ;;  %vm968_vm2 = vcmask (!%p2145_p4), 64512   ;;  %s3297_s6 = smov (!%p2145_p4), 112   ;;  %s3298_s24 = smov (!%p2145_p4), 120  }
 0x23f   : > { %2237 = vmatpush3.bf16.msra.mxu1 (!%p2145_p4), %v2599_v3  ;;  %2230 = vmatprep.subr.bf16.mxu0 (!%p2145_p4), %v3295_v2  ;;  %s3299_s21 = smov (!%p2145_p4), 104  }
 0x240   : > { %2238 = vmatprep.subr.bf16.mxu1 (!%p2145_p4), %v3295_v2  ;;  %2240 = vmatprep.mubr.msk.bf16.mxu1 (!%p2145_p4), %vm3296_vm0, %v3295_v2 }
 0x242   : > { %2231 = vmatpush3.bf16.msra.mxu0 (!%p2145_p4), %v2600_v4 }
 0x243   : > { %2239 = vmatpush3.bf16.msra.mxu1 (!%p2145_p4), %v2601_v5 }
 0x245   : > { %2233 = vmatmul.mubr.msk.bf16.vlgmr.msra.gmra.mrb[0].mxu0 %vm858_vm1, %v2602_v6 }
 0x246   : > { %2241 = vmatmul.mubr.msk.bf16.vlgmr.msra.gmra.mrb[0].mxu1 %vm858_vm1, %v2602_v6 }
 0x318   : > { %v896_v9 = vpop.f32.mrb[0].mxu0 }
 0x319   : > { %v2234_v10 = vpop.f32.mrb[1].mxu0  ;;  %v960_v11 = vpop.f32.mrb[0].mxu1  ;;  %v897_v15 = vadd.f32 %v2146_v8, %v896_v9 }
 0x31a   : > { %v961_v12 = vadd.f32 %v2151_v7, %v960_v11  ;;  %v899_v13 = vpop.f32.mrb[2].mxu0  ;;  %v2242_v14 = vpop.f32.mrb[1].mxu1 }
 0x31b   : > { %v900_v16 = vadd.f32 %v2146_v8, %v899_v13  ;;  %v2235_v17 = vpop.f32.mrb[3].mxu0  ;;  %v963_v18 = vpop.f32.mrb[2].mxu1 }
 0x31c   : > { %v964_v19 = vadd.f32 %v2151_v7, %v963_v18  ;;  %v2243_v20 = vpop.f32.mrb[3].mxu1 }
 0x31d   : > { %v967_v21 = vpack.c.bf16 %v900_v16, %v897_v15 }
 0x31e   : > { %v970_v22 = vpack.c.bf16 %v964_v19, %v961_v12 }
 0x31f   : > { %969 = vst.msk [vmem:[#allocation2] sm:$0xff] %vm968_vm2, %v967_v21  ;;  %984 = vrot.lane.b32.xlu1 %v967_v21, %s3297_s6  ;;  %973 = vrot.lane.b32.xlu0 %v967_v21, %s3298_s24 }
 0x320   : > { %971 = vst.msk [vmem:[#allocation3] sm:$0xff] %vm968_vm2, %v970_v22 }
 0x323   : > { %989 = vrot.lane.b32.xlu1 %v970_v22, %s3297_s6  ;;  %979 = vrot.lane.b32.xlu0 %v970_v22, %s3298_s24 }
 0x327   : > { %999 = vrot.lane.b32.xlu1 %v970_v22, %s3299_s21  ;;  %994 = vrot.lane.b32.xlu0 %v967_v21, %s3299_s21 }
 0x391   : > { %v985_v23 = vpop.permute.xlu1 %984  ;;  %v974_v24 = vpop.permute.xlu0 %973 }
 0x392   : > { %988 = vst.msk [vmem:[#allocation2 + $0x10] sm:$0xff] %vm968_vm2, %v985_v23  ;;  %977 = vst.msk [vmem:[#allocation2 + $0x8] sm:$0xff] %vm968_vm2, %v974_v24 }
 0x395   : > { %v990_v25 = vpop.permute.xlu1 %989  ;;  %v980_v26 = vpop.permute.xlu0 %979 }
 0x396   : > { %993 = vst.msk [vmem:[#allocation3 + $0x10] sm:$0xff] %vm968_vm2, %v990_v25  ;;  %983 = vst.msk [vmem:[#allocation3 + $0x8] sm:$0xff] %vm968_vm2, %v980_v26 }
 0x399   : > { %v1000_v27 = vpop.permute.xlu1 %999  ;;  %v995_v28 = vpop.permute.xlu0 %994 }
 0x39a   : > { %1003 = vst.msk [vmem:[#allocation3 + $0x18] sm:$0xff] %vm968_vm2, %v1000_v27  ;;  %998 = vst.msk [vmem:[#allocation2 + $0x18] sm:$0xff] %vm968_vm2, %v995_v28 }
 0x39b PF: > { %v2603_v29 = vld [vmem:[#allocation9] sm:$0xff]   ;;  %v3300_v30 = vmov 0.0   ;;  %v2604_v31 = vld [vmem:[#allocation9 + $0x8] sm:$0xff]   ;;  %vm3301_vm3 = vmmov 0   ;;  %vm1028_vm4 = vcmask 261120   ;;  %v1004_v32 = vpack.c.bf16 %v3995_v0, %v3995_v0  ;;  %v1083_v44 = vld [vmem:[#allocation2 + $0x10] sm:$0xff] }
 0x39c   : > { %2244 = vmatprep.subr.bf16.mxu0 %v3300_v30  ;;  %2252 = vmatprep.subr.bf16.mxu1 %v3300_v30  ;;  %v1081_v33 = vld [vmem:[#allocation2] sm:$0xff]  ;;  %vm1089_vm5 = vcmask 64512   ;;  %v1082_v35 = vld [vmem:[#allocation2 + $0x8] sm:$0xff]  ;;  %v2155_v37 = vld [vmem:[#allocation10] ss:$0 sm:$0xff]  ;;  %s3302_s28 = smov 104  }
 0x39d   : > { %2245 = vmatpush3.bf16.msra.mxu0 %v2603_v29  ;;  %2248 = vmatprep.mubr.msk.bf16.mxu0 %vm3301_vm3, %v3300_v30  ;;  %v1094_v34 = vsel %vm1089_vm5, %v1081_v33, 0  ;;  %v1140_v36 = vsel %vm1089_vm5, %v1082_v35, 0  ;;  %v1186_v46 = vsel %vm1089_vm5, %v1083_v44, 0  ;;  %s3303_s17 = smov 120   ;;  %s3304_s13 = smov 112   ;;  %vm1274_vm6 = vcmask 130048  }
 0x39e   : > { %2246 = vmatprep.subr.bf16.mxu0 %v3300_v30  ;;  %2254 = vmatprep.mubr.msk.bf16.mxu1 %vm3301_vm3, %v3300_v30  ;;  %v1085_v14 = vld [vmem:[#allocation3] sm:$0xff]  ;;  %s3305_s18 = smov 8   ;;  %s3306_s11 = smov 16   ;;  %vm1521_vm7 = vcmask 195584   ;;  %vm1728_vm8 = vcmask 523264  }
 0x39f   : > { %2253 = vmatpush3.bf16.xpose.msra.mxu1 %v1094_v34  ;;  %s3307_s22 = smov 24   ;;  %s4345_s5 = sld [smem:[#allocation52_spill]] }
 0x3a0   : > { %2264 = vmatprep.subr.bf16.mxu1 %v3300_v30  ;;  %s4346_s25 = sld [smem:[#allocation51_spill]]  ;;  %s1824_s20 = sshll.u32 %s4001_s2, 4  ;;  %s4111_s20 = int_to_ptr.vmem [resolvable:$true] %s1824_s20 }
 0x3a1   : > { %2247 = vmatpush3.bf16.msra.mxu0 %v2604_v31  ;;  %v1084_v47 = vld [vmem:[#allocation2 + $0x18] sm:$0xff]  ;;  %v1086_v31 = vld [vmem:[#allocation3 + $0x8] sm:$0xff]  ;;  %s4347_s6 = sld [smem:[#allocation72_spill]]  ;;  %s1795_s21 = scalar_lea.sflag [#allocation32], %s3943_s10 }
 0x3a2   : > { %2258 = vmatprep.subr.bf16.mxu0 %v3300_v30  ;;  %v1232_v48 = vsel %vm1089_vm5, %v1084_v47, 0  ;;  %p4348_p9 = scmp.ne.s32.totalorder %s4313_s4, 0 }
 0x3a4   : > { %2249 = vmatmul.mubr.msk.bf16.vlgmr.msra.gmra.mrb[0].mxu0 %vm1028_vm4, %v1004_v32 }
 0x3a5   : > { %2260 = vmatprep.mubr.msk.bf16.mxu0 %vm3301_vm3, %v3300_v30  ;;  %s2187_s30 = sshll.u32 %s4345_s5, 3 }
 0x3a6   : > { %s1821_s19 = sadd.s32 %s4346_s25, %s2187_s30 }
 0x3a7   : > { %s2188_s26 = sshll.u32 %s1821_s19, 7 }
 0x3a8   : > { %s4109_s24 = scalar_lea.hbm %s4347_s6, %s2188_s26 }
 0x3aa   : > { %2259 = vmatpush3.bf16.xpose.msra.mxu0 %v1140_v36  ;;  %v1087_v36 = vld [vmem:[#allocation3 + $0x10] sm:$0xff] }
 0x3ab   : > { %2270 = vmatprep.subr.bf16.mxu0 %v3300_v30 }
 0x477   : > { %v1066_v38 = vpop.f32.mrb[0].mxu0 }
 0x478   : > { %v1067_v39 = vadd.f32 %v2155_v37, %v1066_v38  ;;  %v2250_v40 = vpop.f32.mrb[1].mxu0 }
 0x479   : > { %v1069_v41 = vpop.f32.mrb[2].mxu0 }
 0x47a   : > { %v1072_v42 = vmul.f32 0.35355338, %v1067_v39  ;;  %v2251_v43 = vpop.f32.mrb[3].mxu0 }
 0x47b   : > { %v1088_v43 = vld [vmem:[#allocation3 + $0x18] sm:$0xff] }
 0x47c   : > { %v1073_v45 = vpack.c.bf16 %v1072_v42, %v1072_v42 }
 0x47e   : > { %1079 = vrot.lane.b32.xlu1 %v1073_v45, %s3302_s28  ;;  %1075 = vrot.lane.b32.xlu0 %v1073_v45, %s3303_s17  ;;  %s3085_s28 = scalar_lea.vmem %s4111_s20, 512  ;;  %s3308_s17 = smov [#allocation31]  }
 0x47f   : > { %2255 = vmatmul.mubr.msk.bf16.vlgmr.msra.gmra.mrb[0].mxu1 %vm1089_vm5, %v1073_v45  ;;  %p3086_p12 = scmp.ne.s32.totalorder %s4111_s20, %s3085_s28 }
 0x480   : > { %2265 = vmatpush3.bf16.xpose.msra.mxu1 %v1186_v46  ;;  %2266 = vmatprep.mubr.msk.bf16.mxu1 %vm3301_vm3, %v3300_v30 }
 0x481   : > { %2276 = vmatprep.subr.bf16.mxu1 %v3300_v30  ;;  %p3087_p3 = pnand %p3086_p12, %p4348_p9 }
 0x482   : > { %1077 = vrot.lane.b32.xlu0 %v1073_v45, %s3304_s13  ;;  %s3089_s13 = sshll.u32 %s3308_s17, 4  ;;  %s3090_s13 = int_to_ptr.vmem [resolvable:$false] %s3089_s13 }
 0x483   : > { %p3088_p13 = pneg %p3087_p3  ;;  %p3092_p0 = scmp.lt.s32.totalorder %s4111_s20, %s3090_s13 }
 0x4f0   : > { %v1076_v49 = vpop.permute.xlu0 %1075  ;;  %v1080_v51 = vpop.permute.xlu1 %1079 }
 0x4f1   : > { %2261 = vmatmul.mubr.msk.bf16.vlgmr.msra.gmra.mrb[4].mxu0 %vm1089_vm5, %v1076_v49 }
 0x4f2   : > { %2271 = vmatpush3.bf16.xpose.msra.mxu0 %v1232_v48  ;;  %2272 = vmatprep.mubr.msk.bf16.mxu0 %vm3301_vm3, %v3300_v30 }
 0x4f3   : > { %2282 = vmatprep.subr.bf16.mxu0 %v3300_v30 }
 0x4f4   : > { %v1078_v50 = vpop.permute.xlu0 %1077 }
 0x4f5   : > { %2267 = vmatmul.mubr.msk.bf16.vlgmr.msra.gmra.mrb[4].mxu1 %vm1089_vm5, %v1078_v50 }
 0x4f6   : > { %2278 = vmatprep.mubr.msk.bf16.mxu1 %vm3301_vm3, %v3300_v30  ;;  %2277 = vmatpush3.bf16.msra.mxu1 %v1085_v14 }
 0x4f7   : > { %2288 = vmatprep.subr.bf16.mxu1 %v3300_v30 }
 0x4f9   : > { %2273 = vmatmul.mubr.msk.bf16.vlgmr.msra.gmra.mrb[8].mxu0 %vm1089_vm5, %v1080_v51 }
 0x4fa   : > { %2284 = vmatprep.mubr.msk.bf16.mxu0 %vm3301_vm3, %v3300_v30  ;;  %2283 = vmatpush3.bf16.msra.mxu0 %v1086_v31  ;;  %v2609_v31 = vld [vmem:[#allocation24] sm:$0xff]  }
 0x4fb   : > { %2294 = vmatprep.subr.bf16.mxu0 %v3300_v30 }
 0x552   : > { %v1130_v52 = vpop.f32.mrb[0].mxu1 }
 0x553   : > { %v2256_v53 = vpop.f32.mrb[1].mxu1  ;;  %v1275_v54 = vsel %vm1274_vm6, %v1130_v52, -inf }
 0x554   : > { %1276 = vmax.xlane.f32.xlu1 %v1275_v54  ;;  %v1133_v55 = vpop.f32.mrb[2].mxu1  ;;  %v2605_v54 = vld [vmem:[#allocation18] sm:$0xff]  }
 0x555   : > { %v2257_v56 = vpop.f32.mrb[3].mxu1  ;;  %v2606_v55 = vld [vmem:[#allocation18 + $0x8] sm:$0xff]  }
 0x5c4   : > { %v1176_v57 = vpop.f32.mrb[4].mxu0 }
 0x5c5   : > { %v2262_v58 = vpop.f32.mrb[5].mxu0  ;;  %v1278_v59 = vsel %vm1274_vm6, %v1176_v57, -inf }
 0x5c6   : > { %1279 = vmax.xlane.f32.xlu0 %v1278_v59  ;;  %v1179_v60 = vpop.f32.mrb[6].mxu0 }
 0x5c7   : > { %v2263_v61 = vpop.f32.mrb[7].mxu0 }
 0x5c8   : > { %v1222_v62 = vpop.f32.mrb[4].mxu1 }
 0x5c9   : > { %v2268_v63 = vpop.f32.mrb[5].mxu1  ;;  %v1281_v1 = vsel %vm1274_vm6, %v1222_v62, -inf }
 0x5ca   : > { %v1225_v2 = vpop.f32.mrb[6].mxu1  ;;  %1282 = vmax.xlane.f32.xlu0 %v1281_v1 }
 0x5cb   : > { %v2269_v3 = vpop.f32.mrb[7].mxu1 }
 0x5cc   : > { %v1268_v4 = vpop.f32.mrb[8].mxu0 }
 0x5cd   : > { %v2274_v5 = vpop.f32.mrb[9].mxu0  ;;  %v1284_v6 = vsel %vm1274_vm6, %v1268_v4, -inf }
 0x5ce   : > { %1285 = vmax.xlane.f32.xlu1 %v1284_v6  ;;  %v1271_v7 = vpop.f32.mrb[10].mxu0 }
 0x5cf   : > { %v2275_v8 = vpop.f32.mrb[11].mxu0 }
 0x5e1   : > { %v1277_v9 = vpop.xlane.xlu1 %1276 }
 0x5e2   : > { %v1287_v10 = vsub.f32 %v1130_v52, %v1277_v9 }
 0x5e4   : > { %v1291_v11 = vmul.f32 1.442695, %v1287_v10 }
 0x5e6   : > { %2613 = vpow2.f32 %v1291_v11 }
 0x5f0   : > { %v2614_v12 = vpop.eup %2613 }
 0x5f1   : > { %v1299_v13 = vsel %vm1274_vm6, %v2614_v12, 0.0 }
 0x5f2   : > { %1300 = vadd.xlane.f32.xlu0 %v1299_v13 }
 0x653   : > { %v1280_v15 = vpop.xlane.xlu0 %1279 }
 0x654   : > { %v1288_v16 = vsub.f32 %v1176_v57, %v1280_v15  ;;  %v2167_v15 = vld [vmem:[#allocation19] ss:$0 sm:$0xff] }
 0x656   : > { %v1293_v17 = vmul.f32 1.442695, %v1288_v16 }
 0x657   : > { %v1283_v18 = vpop.xlane.xlu0 %1282 }
 0x658   : > { %2615 = vpow2.f32 %v1293_v17  ;;  %v1289_v19 = vsub.f32 %v1222_v62, %v1283_v18 }
 0x65a   : > { %v1295_v20 = vmul.f32 1.442695, %v1289_v19 }
 0x65b   : > { %v1286_v21 = vpop.xlane.xlu1 %1285 }
 0x65c   : > { %2617 = vpow2.f32 %v1295_v20  ;;  %v1290_v22 = vsub.f32 %v1268_v4, %v1286_v21 }
 0x65e   : > { %v1297_v23 = vmul.f32 1.442695, %v1290_v22 }
 0x660   : > { %2619 = vpow2.f32 %v1297_v23 }
 0x662   : > { %v2616_v24 = vpop.eup %2615 }
 0x663   : > { %v1302_v25 = vsel %vm1274_vm6, %v2616_v24, 0.0 }
 0x664   : > { %1303 = vadd.xlane.f32.xlu1 %v1302_v25 }
 0x666   : > { %v2618_v26 = vpop.eup %2617 }
 0x667   : > { %v1305_v27 = vsel %vm1274_vm6, %v2618_v26, 0.0 }
 0x668   : > { %1306 = vadd.xlane.f32.xlu0 %v1305_v27 }
 0x66a   : > { %v2620_v28 = vpop.eup %2619 }
 0x66b   : > { %v1308_v29 = vsel %vm1274_vm6, %v2620_v28, 0.0 }
 0x66c   : > { %1309 = vadd.xlane.f32.xlu1 %v1308_v29  ;;  %v2608_v29 = vld [vmem:[#allocation21 + $0x8] sm:$0xff]  }
 0x67f   : > { %v1301_v32 = vpop.xlane.xlu0 %1300 }
 0x680   : > { %2621 = vrcp.f32 %v1301_v32 }
 0x68a   : > { %v2622_v33 = vpop.eup %2621 }
 0x68b   : > { %v1319_v34 = vmul.f32 %v2622_v33, %v2614_v12 }
 0x68d   : > { %1327 = vst.msk [vmem:[%s4001_s2] sm:$0xff] %vm1274_vm6, %v1319_v34  ;;  %v1323_v35 = vpack.c.bf16 %v1319_v34, %v1319_v34 }
 0x68f   : > { %2279 = vmatmul.mubr.msk.bf16.vlgmr.msra.gmra.mrb[8].mxu1 %vm1274_vm6, %v1323_v35 }
 0x690   : > { %2289 = vmatpush3.bf16.msra.mxu1 %v1087_v36  ;;  %2290 = vmatprep.mubr.msk.bf16.mxu1 %vm3301_vm3, %v3300_v30  ;;  %v4093_v36 = vld [vmem:[#allocation27] ss:$0 sm:$0xff] }
 0x691   : > { %2300 = vmatprep.subr.bf16.mxu1 %v3300_v30 }
 0x6f1   : > { %v1304_v37 = vpop.xlane.xlu1 %1303 }
 0x6f2   : > { %2623 = vrcp.f32 %v1304_v37 }
 0x6f5   : > { %v1307_v38 = vpop.xlane.xlu0 %1306 }
 0x6f6   : > { %2625 = vrcp.f32 %v1307_v38  ;;  %v4095_v38 = vld [vmem:[#allocation28] ss:$0 sm:$0xff] }
 0x6f9   : > { %v1310_v39 = vpop.xlane.xlu1 %1309 }
 0x6fa   : > { %2627 = vrcp.f32 %v1310_v39 }
 0x6fc   : > { %v2624_v40 = vpop.eup %2623 }
 0x6fd   : > { %v1320_v41 = vmul.f32 %v2624_v40, %v2616_v24 }
 0x6ff   : > { %1328 = vst.msk [vmem:[%s4001_s2 + $0x8] sm:$0xff] %vm1274_vm6, %v1320_v41  ;;  %v1324_v42 = vpack.c.bf16 %v1320_v41, %v1320_v41 }
 0x700   : > { %v2626_v44 = vpop.eup %2625 }
 0x701   : > { %v1321_v45 = vmul.f32 %v2626_v44, %v2618_v26  ;;  %2285 = vmatmul.mubr.msk.bf16.vlgmr.msra.gmra.mrb[12].mxu0 %vm1274_vm6, %v1324_v42  ;;  %v2611_v42 = vld [vmem:[#allocation24 + $0x10] sm:$0xff]   ;;  %v2173_v44 = vld [vmem:[#allocation22] ss:$0 sm:$0xff] }
 0x702   : > { %2295 = vmatpush3.bf16.msra.mxu0 %v1088_v43  ;;  %2296 = vmatprep.mubr.msk.bf16.mxu0 %vm3301_vm3, %v3300_v30  ;;  %v2612_v43 = vld [vmem:[#allocation24 + $0x18] sm:$0xff]  }
 0x703   : > { %1329 = vst.msk [vmem:[%s4001_s2 + $0x10] sm:$0xff] %vm1274_vm6, %v1321_v45  ;;  %v1325_v46 = vpack.c.bf16 %v1321_v45, %v1321_v45  ;;  %2308 = vmatprep.subr.bf16.mxu0 %v3300_v30 }
 0x704   : > { %v2628_v47 = vpop.eup %2627 }
 0x705   : > { %v1322_v48 = vmul.f32 %v2628_v47, %v2620_v28  ;;  %2291 = vmatmul.mubr.msk.bf16.vlgmr.msra.gmra.mrb[12].mxu1 %vm1274_vm6, %v1325_v46  ;;  %v2607_v28 = vld [vmem:[#allocation21] sm:$0xff]  }
 0x706   : > { %2304 = vmatprep.mubr.msk.bf16.mxu1 %vm3301_vm3, %v3300_v30  ;;  %2301 = vmatpush3.bf16.msra.mxu1 %v2605_v54 }
 0x707   : > { %1330 = vst.msk [vmem:[%s4001_s2 + $0x18] sm:$0xff] %vm1274_vm6, %v1322_v48  ;;  %v1326_v49 = vpack.c.bf16 %v1322_v48, %v1322_v48  ;;  %2302 = vmatprep.subr.bf16.mxu1 %v3300_v30  ;;  %s3091_s2 = scalar_lea.vmem %s3090_s13, 1024 }
 0x708   : > { %p3093_p2 = scmp.lt.s32.totalorder %s3091_s2, %s3085_s28 }
 0x709   : > { %2297 = vmatmul.mubr.msk.bf16.vlgmr.msra.gmra.mrb[16].mxu0 %vm1274_vm6, %v1326_v49 }
 0x70a   : > { %2312 = vmatprep.mubr.msk.bf16.mxu0 %vm3301_vm3, %v3300_v30  ;;  %2303 = vmatpush3.bf16.msra.mxu1 %v2606_v55  ;;  %p3094_p1 = por %p3093_p2, %p3092_p0 }
 0x70b   : > { %2316 = vmatprep.subr.bf16.mxu1 %v3300_v30  ;;  %2309 = vmatpush3.bf16.msra.mxu0 %v2607_v28 }
 0x70c   : > { %2310 = vmatprep.subr.bf16.mxu0 %v3300_v30  ;;  %p3095_p8 = pnand %p3094_p1, %p3088_p13 }
 0x70f   : > { %2311 = vmatpush3.bf16.msra.mxu0 %v2608_v29 }
 0x762   : > { %v1368_v50 = vpop.f32.mrb[8].mxu1 }
 0x763   : > { %v2280_v51 = vpop.f32.mrb[9].mxu1  ;;  %v1503_v10 = vpack.c.bf16 %v1368_v50, %v1368_v50 }
 0x764   : > { %v1371_v52 = vpop.f32.mrb[10].mxu1 }
 0x765   : > { %v2281_v53 = vpop.f32.mrb[11].mxu1  ;;  %v2177_v52 = vld [vmem:[#allocation25] ss:$0 sm:$0xff] }
 0x7d4   : > { %v1411_v56 = vpop.f32.mrb[12].mxu0 }
 0x7d5   : > { %v1504_v57 = vpack.c.bf16 %v1411_v56, %v1411_v56  ;;  %v2286_v58 = vpop.f32.mrb[13].mxu0 }
 0x7d6   : > { %v1414_v59 = vpop.f32.mrb[14].mxu0 }
 0x7d7   : > { %1508 = vrot.lane.b32.xlu0 %v1504_v57, %s3305_s18  ;;  %v2287_v60 = vpop.f32.mrb[15].mxu0 }
 0x7d8   : > { %v1454_v61 = vpop.f32.mrb[12].mxu1 }
 0x7d9   : > { %v1505_v62 = vpack.c.bf16 %v1454_v61, %v1454_v61  ;;  %v2292_v63 = vpop.f32.mrb[13].mxu1 }
 0x7da   : > { %v1457_v1 = vpop.f32.mrb[14].mxu1 }
 0x7db   : > { %v2293_v2 = vpop.f32.mrb[15].mxu1  ;;  %1511 = vrot.lane.b32.xlu1 %v1505_v62, %s3306_s11 }
 0x7dc   : > { %v1497_v3 = vpop.f32.mrb[16].mxu0 }
 0x7dd   : > { %v1506_v4 = vpack.c.bf16 %v1497_v3, %v1497_v3  ;;  %v2298_v5 = vpop.f32.mrb[17].mxu0 }
 0x7de   : > { %v1500_v6 = vpop.f32.mrb[18].mxu0 }
 0x7df   : > { %1514 = vrot.lane.b32.xlu1 %v1506_v4, %s3307_s22  ;;  %v2299_v7 = vpop.f32.mrb[19].mxu0 }
 0x849   : > { %v1509_v8 = vpop.permute.xlu0 %1508 }
 0x84a   : > { %v1518_v11 = vsel %vm1089_vm5, %v1503_v10, %v1509_v8 }
 0x84d   : > { %v1512_v9 = vpop.permute.xlu1 %1511 }
 0x84e   : > { %v1520_v12 = vsel %vm1274_vm6, %v1518_v11, %v1512_v9 }
 0x851   : > { %v1515_v13 = vpop.permute.xlu1 %1514 }
 0x852   : > { %v1523_v14 = vsel %vm1521_vm7, %v1520_v12, %v1515_v13 }
 0x853   : > { %2305 = vmatmul.mubr.msk.bf16.vlgmr.msra.gmra.mrb[16].mxu1 %vm1028_vm4, %v1523_v14 }
 0x854   : > { %2324 = vmatprep.mubr.msk.bf16.mxu1 %vm3301_vm3, %v3300_v30  ;;  %2317 = vmatpush3.bf16.msra.mxu1 %v2609_v31 }
 0x855   : > { %2318 = vmatprep.subr.bf16.mxu1 %v3300_v30 }
 0x926   : > { %v1583_v16 = vpop.f32.mrb[16].mxu1 }
 0x927   : > { %v1584_v17 = vadd.f32 %v2167_v15, %v1583_v16  ;;  %v2306_v18 = vpop.f32.mrb[17].mxu1 }
 0x928   : > { %v1586_v19 = vpop.f32.mrb[18].mxu1 }
 0x929   : > { %v1591_v20 = vadd.f32 %v1584_v17, %v3995_v0  ;;  %v2307_v21 = vpop.f32.mrb[19].mxu1  ;;  %v2610_v0 = vld [vmem:[#allocation24 + $0x8] sm:$0xff]  }
 0x92a   : > { %2319 = vmatpush3.bf16.msra.mxu1 %v2610_v0 }
 0x92b   : > { %v1592_v22 = vsel %vm1028_vm4, %v1591_v20, 0.0  ;;  %2320 = vmatprep.subr.bf16.mxu1 %v3300_v30 }
 0x92c   : > { %1593 = vadd.xlane.f32.xlu0 %v1592_v22 }
 0x92e   : > { %2321 = vmatpush3.bf16.msra.mxu1 %v2611_v42 }
 0x92f   : > { %2322 = vmatprep.subr.bf16.mxu1 %v3300_v30 }
 0x932   : > { %2323 = vmatpush3.bf16.msra.mxu1 %v2612_v43 }
 0x9b9   : > { %v1594_v23 = vpop.xlane.xlu0 %1593 }
 0x9ba   : > { %v1596_v24 = vmul.f32 0.03125, %v1594_v23 }
 0x9bc   : > { %v1597_v25 = vsub.f32 %v1591_v20, %v1596_v24 }
 0x9be   : > { %v1598_v26 = vmul.f32 %v1597_v25, %v1597_v25 }
 0x9c0   : > { %v1599_v27 = vsel %vm1028_vm4, %v1598_v26, 0.0 }
 0x9c1   : > { %1600 = vadd.xlane.f32.xlu1 %v1599_v27 }
 0xa4e   : > { %v1601_v32 = vpop.xlane.xlu1 %1600 }
 0xa4f   : > { %v1602_v33 = vmul.f32 0.03125, %v1601_v32 }
 0xa51   : > { %v1603_v34 = vadd.f32 1e-06, %v1602_v33 }
 0xa53   : > { %2629 = vrsqrt.f32 %v1603_v34 }
 0xa5d   : > { %v2630_v35 = vpop.eup %2629 }
 0xa5e   : > { %v1605_v37 = vmul.f32 %v2630_v35, %v1597_v25 }
 0xa60   : > { %v1612_v39 = vmul.f32 %v4093_v36, %v1605_v37 }
 0xa62   : > { %v1619_v40 = vadd.f32 %v4095_v38, %v1612_v39 }
 0xa64   : > { %v1620_v41 = vpack.c.bf16 %v1619_v40, %v1619_v40 }
 0xa66   : > { %2313 = vmatmul.mubr.msk.bf16.vlgmr.msra.gmra.mrb[20].mxu0 %vm1028_vm4, %v1620_v41 }
 0xb39   : > { %v1681_v45 = vpop.f32.mrb[20].mxu0 }
 0xb3a   : > { %v1682_v46 = vadd.f32 %v2173_v44, %v1681_v45  ;;  %v2314_v47 = vpop.f32.mrb[21].mxu0 }
 0xb3b   : > { %v1684_v48 = vpop.f32.mrb[22].mxu0 }
 0xb3c   : > { %v1687_v49 = vmax.f32 %v1682_v46, 0.0  ;;  %v2315_v50 = vpop.f32.mrb[23].mxu0 }
 0xb3e   : > { %v1688_v51 = vpack.c.bf16 %v1687_v49, %v1687_v49 }
 0xb40   : > { %2325 = vmatmul.mubr.msk.bf16.vlgmr.msra.gmra.mrb[20].mxu1 %vm1728_vm8, %v1688_v51 }
 0xc13   : > { %v1766_v53 = vpop.f32.mrb[20].mxu1 }
 0xc14   : > { %v1767_v54 = vadd.f32 %v2177_v52, %v1766_v53  ;;  %v2326_v55 = vpop.f32.mrb[21].mxu1 }
 0xc15   : > { %v1769_v30 = vpop.f32.mrb[22].mxu1 }
 0xc16   : > { %v2327_v56 = vpop.f32.mrb[23].mxu1  ;;  %v1772_v57 = vadd.f32 %v1767_v54, %v1619_v40 }
 0xc18   : > { %v1773_v58 = vsel %vm1028_vm4, %v1772_v57, 0.0 }
 0xc19   : > { %1774 = vadd.xlane.f32.xlu0 %v1773_v58 }
 0xca6   : > { %v1775_v59 = vpop.xlane.xlu0 %1774 }
 0xca7   : > { %v1776_v60 = vmul.f32 0.03125, %v1775_v59 }
 0xca9   : > { %v1777_v61 = vsub.f32 %v1772_v57, %v1776_v60 }
 0xcab   : > { %v1778_v62 = vmul.f32 %v1777_v61, %v1777_v61 }
 0xcad   : > { %v1779_v63 = vsel %vm1028_vm4, %v1778_v62, 0.0 }
 0xcae   : > { %1780 = vadd.xlane.f32.xlu0 %v1779_v63 }
 0xcaf   : > { %3098 = shalt.err (!%p3095_p8)
}
 0xcb0   : > { %s3099_s11 = scalar_lea.hbm %s4109_s24, 512  ;;  %s3103_s19 = scalar_lea.hbm %s4347_s6, 2048 }
 0xcb1   : > { %p3100_p7 = scmp.ne.s32.totalorder %s4109_s24, %s3099_s11  ;;  %p3104_p10 = scmp.lt.u32.totalorder %s4109_s24, %s4347_s6 }
 0xcb2   : > { %p3105_p5 = scmp.lt.u32.totalorder %s3103_s19, %s3099_s11  ;;  %p3107_p12 = scmp.lt.u32.totalorder %s3099_s11, %s4109_s24 }
 0xcb3   : > { %p3101_p6 = pnand %p3100_p7, %p4348_p9 }
 0xcb4   : > { %p3106_p4 = por %p3105_p5, %p3104_p10 }
 0xcb5   : > { %p3102_p11 = pneg %p3101_p6 }
 0xcb6   : > { %p3108_p3 = por %p3107_p12, %p3106_p4 }
 0xcb8   : > { %p3109_p13 = pnand %p3108_p3, %p3102_p11 }
 0xcba   : > { %3112 = shalt.err (!%p3109_p13)
}
 0xcbb   : > { %s3309_s23 = smov 128   ;;  %s3310_s28 = smov 256  }
 0xcbc   : > { %2389 = dma.vmem_to_hbm [thread:$0]  (%p4348_p9), %s4111_s20, 512, %s4109_s24, %s1795_s21, %s3309_s23, %s3310_s28, %s3305_s18  }
 0xcbd   : > { %s2185_s17 = sshll.u32 %s4345_s5, 1  ;;  %s1810_s11 = sshll.u32 %s3999_s9, 4  ;;  %s4148_s11 = int_to_ptr.vmem [resolvable:$true] %s1810_s11 }
 0xcbe   : > { %s1806_s13 = sadd.s32 %s4346_s25, %s2185_s17  ;;  %s4349_s19 = sld [smem:[#allocation71_spill]] }
 0xcbf   : > { %s2186_s2 = sshll.u32 %s1806_s13, 7  ;;  %s1790_s5 = scalar_lea.sflag [#allocation6], %s3943_s10 }
 0xcc0   : > { %s3113_s25 = scalar_lea.vmem %s4148_s11, 128  ;;  %s3311_s20 = smov [#allocation30]  }
 0xcc1   : > { %p3114_p0 = scmp.ne.s32.totalorder %s4148_s11, %s3113_s25  ;;  %s3117_s24 = sshll.u32 %s3311_s20, 4  ;;  %s3118_s24 = int_to_ptr.vmem [resolvable:$false] %s3117_s24 }
 0xcc2   : > { %s3119_s21 = scalar_lea.vmem %s3118_s24, 256  ;;  %p3120_p8 = scmp.lt.s32.totalorder %s4148_s11, %s3118_s24 }
 0xcc3   : > { %p3115_p2 = pnand %p3114_p0, %p4348_p9  ;;  %p3121_p7 = scmp.lt.s32.totalorder %s3119_s21, %s3113_s25 }
 0xcc4   : > { %s4350_s3 = smov %s4349_s19  ;;  %s4146_s18 = scalar_lea.hbm %s4349_s19, %s2186_s2 }
 0xcc5   : > { %p3116_p1 = pneg %p3115_p2  ;;  %p3122_p6 = por %p3121_p7, %p3120_p8 }
 0xcc7   : > { %p3123_p11 = pnand %p3122_p6, %p3116_p1 }
 0xd3b   : > { %v1781_v1 = vpop.xlane.xlu0 %1780 }
 0xd3c   : > { %v1782_v2 = vmul.f32 0.03125, %v1781_v1 }
 0xd3e   : > { %v1783_v3 = vadd.f32 1e-06, %v1782_v2 }
 0xd40   : > { %2631 = vrsqrt.f32 %v1783_v3 }
 0xd4a   : > { %v2632_v4 = vpop.eup %2631 }
 0xd4b   : > { %v1785_v5 = vmul.f32 %v2632_v4, %v1777_v61 }
 0xd4d   : > { %v1786_v6 = vmul.f32 %v4093_v36, %v1785_v5 }
 0xd4f   : > { %v1787_v7 = vadd.f32 %v4095_v38, %v1786_v6 }
 0xd51   : > { %1788 = vst.msk [vmem:[%s3999_s9] sm:$0xff] %vm1028_vm4, %v1787_v7 }
 0xd52   : > { %3126 = shalt.err (!%p3123_p11)
}
 0xd53   : > { %s3127_s10 = scalar_lea.hbm %s4146_s18, 128  ;;  %s3131_s23 = scalar_lea.hbm %s4350_s3, 512 }
 0xd54   : > { %p3128_p10 = scmp.ne.s32.totalorder %s4146_s18, %s3127_s10  ;;  %p3132_p12 = scmp.lt.u32.totalorder %s4146_s18, %s4350_s3 }
 0xd55   : > { %p3133_p3 = scmp.lt.u32.totalorder %s3131_s23, %s3127_s10  ;;  %p3135_p0 = scmp.lt.u32.totalorder %s3127_s10, %s4146_s18 }
 0xd56   : > { %p3129_p5 = pnand %p3128_p10, %p4348_p9 }
 0xd57   : > { %p3134_p13 = por %p3133_p3, %p3132_p12 }
 0xd58   : > { %p3130_p4 = pneg %p3129_p5 }
 0xd59   : > { %p3136_p2 = por %p3135_p0, %p3134_p13 }
 0xd5b   : > { %p3137_p1 = pnand %p3136_p2, %p3130_p4 }
 0xd5d   : > { %3140 = shalt.err (!%p3137_p1)
}
 0xd5e   : > { %2388 = dma.vmem_to_hbm [thread:$0]  (%p4348_p9), %s4148_s11, 128, %s4146_s18, %s1790_s5  }
 0xd5f PF: > { %s4351_s13 = sld [smem:[#allocation48_spill]]  ;;  %p2478_p8 = scmp.ge.s32.totalorder %s3275_s1, 2 }
 0xd60   : > { %p4352_p7 = scmp.ne.s32.totalorder %s4314_s27, 0 }
 0xd62   : > { %p2443_p6 = pnand %p2478_p8, %p4352_p7 }
 0xd65   : > { %s1839_s2 = sand.u32 1, %s4351_s13  }
 0xd66   : > { %s1840_s22 = scalar_lea.sflag [#allocation6], %s1839_s2 }
 0xd67   : > { %3226 = dma.done.wait (!%p2443_p6), %s1840_s22, 128  }
 0xd68   : > { %3228 = vsyncadd (!%p2443_p6), %s1840_s22, 4294967168  ;;  %s1849_s30 = scalar_lea.sflag [#allocation32], %s1839_s2 }
 0xd69   : > { %3230 = dma.done.wait (!%p2443_p6), %s1849_s30, 512  }
 0xd6a   : > { %3232 = vsyncadd (!%p2443_p6), %s1849_s30, 4294966784  ;;  %s47_s1 = sadd.s32 1, %s3275_s1   ;;  %s4353_s24 = sld [smem:[#allocation46_spill]] }
 0xd6b   : > { %p44_p11 = scmp.ge.s32.totalorder %s47_s1, 6   ;;  %s4354_s25 = sld [smem:[#allocation47_spill]] }
 0xd6c   : > { %s4355_s27 = sld [smem:[#allocation49_spill]]  ;;  %s4356_s28 = sld [smem:[#allocation50_spill]] }
 0xd6d   : > { %s4357_s4 = sld [smem:[#allocation53_spill]]  ;;  %s4358_s30 = sld [smem:[#allocation54_spill]] }
 0xd6e   : > { %s4359_s11 = smov %s4366_s29  ;;  %s4360_s19 = smov %s4370_s0 }
 0xd6f   : > { %s4361_s26 = smov %s3817_s7  ;;  %s4362_s29 = smov %s3820_s8 }
 0xd70   : > { %s4364_s18 = smov %s4359_s11  ;;  %46 = sbr.rel (!%p44_p11) target bundleno = 37 (0x25), region = 225 }
 0xd73   : > { %s4363_s0 = smov %s4357_s4 }
 0xd77   :  { %1854 = vsyncpa [#allocation5], 1 }
 0xd78   :  { %1856 = vsyncpa [#allocation5 + $0x1], 1 }
 0xd79   :  { %1857 = vsyncpa [#allocation8], 1 }
 0xd7a   :  { %1859 = vsyncpa [#allocation8 + $0x1], 1 }
 0xd7b   :  { %1860 = vsyncpa [#allocation11], 1 }
 0xd7c   :  { %1861 = vsyncpa [#allocation14], 1 }
 0xd7d   :  { %1862 = vsyncpa [#allocation17], 1 }
 0xd7e   :  { %1863 = vsyncpa [#allocation20], 1 }
 0xd7f   :  { %1864 = vsyncpa [#allocation23], 1 }
 0xd80   :  { %1865 = vsyncpa [#allocation26], 1 }
 0xd81   :  { %1866 = vsyncpa [#allocation29], 1 }
 0xd82   :  { %1867 = vsyncpa [#allocation6], 1 }
 0xd83   :  { %1869 = vsyncpa [#allocation6 + $0x1], 1 }
 0xd84   :  { %1870 = vsyncpa [#allocation32], 1 }
 0xd85   :  { %1872 = vsyncpa [#allocation32 + $0x1], 1 }

</bundles_post_ra>
